<compile_context>
chip_gen: v7x
topology: tpu7x:2x2x1
jax: 0.10.0
libtpu: 0.0.40
codegen_flags: <defaults>
</compile_context>

<pallas_src>
import functools

import jax
import jax.numpy as jnp
from jax import lax
from jax.experimental import pallas as pl
from jax.experimental.pallas import tpu as pltpu


# ----------------------------------------------------------------------------
# Chunk / VMEM sizing helpers
# ----------------------------------------------------------------------------
def _vmem_chunk_bytes(tc, B, D, K, H, out_bytes=2):
    bf16, f32 = 2, 4
    x_blk = tc * B * D * bf16
    w_blk = D * K * H * bf16
    out_blk = tc * B * H * out_bytes
    pool_blk = B * H * f32
    small = (2 * 2 * H + B * H) * f32          # v, b, c0 blocks
    u_scr = tc * B * K * H * f32
    c_scr = B * H * f32
    # Streamed blocks are double-buffered by the BlockSpec pipeline.
    return 2 * (x_blk + w_blk + out_blk + pool_blk + small) + u_scr + c_scr


def _choose_t_chunk(T, B, D, K, H, budget=20 << 20, max_chunk=64):
    """Largest divisor of T (<= max_chunk) whose chunk working set fits budget.

    The 20 MiB budget is safe on every generation (v7x: 64 MiB physical VMEM).
    """
    tc = min(T, max_chunk)
    while tc > 1:
        if T % tc == 0 and _vmem_chunk_bytes(tc, B, D, K, H) <= budget:
            return tc
        tc -= 1
    return 1


# ----------------------------------------------------------------------------
# Pallas kernel: one direction x one T-chunk of one SRU layer
# ----------------------------------------------------------------------------
def _bisru_dir_kernel(x_ref, w_ref, v_ref, b_ref, c0_ref,
                      out_ref, pool_ref,
                      u_scr, c_scr,
                      *, skip_proj: bool, compute_pool: bool, inv_t: float):
    """Grid = (direction, T-chunk).

    x:    (Tc, B, D)   bf16 input chunk (already time-reversed chunk order for
                       the backward direction via the index_map)
    w:    (D, K*H)     bf16 per-direction weights, gate-major [x~ | f | r | skip]
    v,b:  (2, H)       f32 rows (forget, reset) for this direction
    c0:   (B, H)       f32 initial cell state for this direction
    out:  (Tc, B, H)   per-direction h chunk (lands in [:H] fwd / [H:] bwd lanes)
    pool: (B, H)       running mean over T (resident accumulator across chunks)
    u_scr:(Tc, B, K*H) f32 gate scratch
    c_scr:(B, H)       f32 cell-state carry across T-chunks
    """
    Tc, B, D = x_ref.shape
    H = c0_ref.shape[-1]
    K = 4 if skip_proj else 3

    rev = pl.program_id(0)                    # 0 = forward, 1 = backward
    first_chunk = pl.program_id(1) == 0

    # --- time-parallel bf16 MXU projection straight into the gate scratch ----
    xm = x_ref[...].reshape(Tc * B, D)        # B is padded to a sublane multiple
    u_scr[...] = jnp.dot(
        xm, w_ref[...], preferred_element_type=jnp.float32
    ).reshape(Tc, B, K * H)

    @pl.when(first_chunk)
    def _():
        c_scr[...] = c0_ref[...]
        pool_ref[...] = jnp.zeros_like(pool_ref)

    # --- recurrence params: broadcast once per chunk, not once per step ------
    vv = v_ref[...]
    bb = b_ref[...]
    vf = jnp.broadcast_to(vv[0:1, :], (B, H))
    vr = jnp.broadcast_to(vv[1:2, :], (B, H))
    bf = jnp.broadcast_to(bb[0:1, :], (B, H))
    br = jnp.broadcast_to(bb[1:2, :], (B, H))

    def _sigmoid(z):
        # 0.5*(tanh(z/2)+1): routes the transcendental to the EUP slot so the
        # VPU-bound recurrence body keeps its VALU slots.
        return 0.5 * jnp.tanh(0.5 * z) + 0.5

    def step(s, carry):
        c, pooled = carry
        # forward walks local time 0..Tc-1; backward walks Tc-1..0 (the grid
        # index_map already reversed the chunk order for the backward pass).
        i = rev * (Tc - 1) + (1 - 2 * rev) * s
        u = u_scr[i]                          # (B, K*H); 128-aligned gate slices
        ux = u[:, 0 * H:1 * H]
        uf = u[:, 1 * H:2 * H]
        ur = u[:, 2 * H:3 * H]
        if skip_proj:
            resid = u[:, 3 * H:4 * H]
        else:
            resid = x_ref[i].astype(jnp.float32)   # identity highway (D == H)
        f = _sigmoid(uf + vf * c + bf)
        c_new = f * c + (1.0 - f) * ux
        r = _sigmoid(ur + vr * c + br)
        h = r * c_new + (1.0 - r) * resid
        out_ref[i] = h.astype(out_ref.dtype)       # write h in place, no epilogue
        if compute_pool:
            pooled = pooled + h
        return c_new, pooled

    # Partial unroll: EUP/VPU overlap across neighbouring steps without blowing
    # vreg live ranges at production chunk sizes.
    c_fin, pool_sum = lax.fori_loop(
        0, Tc, step,
        (c_scr[...], jnp.zeros((B, H), jnp.float32)),
        unroll=min(8, Tc))

    c_scr[...] = c_fin                             # carried to the next T-chunk
    if compute_pool:
        pool_ref[...] += pool_sum * inv_t


# ----------------------------------------------------------------------------
# pallas_call wrapper: one bidirectional SRU layer
# ----------------------------------------------------------------------------
def bisru_layer(x, w, v, b, c0, *, skip_proj: bool, compute_pool: bool = True,
                out_dtype=jnp.bfloat16):
    """Runs one fused bidirectional SRU layer.

    x:  (T, B, D) bf16, w: (2, D, K*H) bf16, v/b: (2, 2, H) f32, c0: (2, B, H) f32.
    Returns (out (T, B, 2H) out_dtype with [:, :, :H]=fwd / [:, :, H:]=bwd,
             pooled (B, 2H) f32 mean over T when compute_pool else zeros).
    """
    T, B, D = x.shape
    H = c0.shape[-1]
    K = 4 if skip_proj else 3
    assert H % 128 == 0, "hidden size must be a multiple of 128 (lane width)"
    assert w.shape == (2, D, K * H), (w.shape, (2, D, K * H))
    assert skip_proj or D == H

    tc = _choose_t_chunk(T, B, D, K, H)
    n_chunks = T // tc

    def t_block(d, t):
        # forward (d=0): chunk t;  backward (d=1): chunk n_chunks-1-t.
        return d * (n_chunks - 1) + (1 - 2 * d) * t

    kernel = functools.partial(_bisru_dir_kernel, skip_proj=skip_proj,
                               compute_pool=compute_pool, inv_t=1.0 / float(T))

    est = _vmem_chunk_bytes(tc, B, D, K, H)
    vmem_limit = int(min(64 << 20, max(32 << 20, 2 * est)))

    out, pooled = pl.pallas_call(
        kernel,
        grid=(2, n_chunks),
        in_specs=[
            pl.BlockSpec((tc, B, D), lambda d, t: (t_block(d, t), 0, 0)),
            pl.BlockSpec((None, D, K * H), lambda d, t: (d, 0, 0)),
            pl.BlockSpec((None, 2, H), lambda d, t: (d, 0, 0)),
            pl.BlockSpec((None, 2, H), lambda d, t: (d, 0, 0)),
            pl.BlockSpec((None, B, H), lambda d, t: (d, 0, 0)),
        ],
        out_specs=(
            pl.BlockSpec((tc, B, H), lambda d, t: (t_block(d, t), 0, d)),
            pl.BlockSpec((B, H), lambda d, t: (0, d)),
        ),
        out_shape=(jax.ShapeDtypeStruct((T, B, 2 * H), out_dtype),
                   jax.ShapeDtypeStruct((B, 2 * H), jnp.float32)),
        scratch_shapes=[pltpu.VMEM((tc, B, K * H), jnp.float32),
                        pltpu.VMEM((B, H), jnp.float32)],
        compiler_params=pltpu.CompilerParams(
            dimension_semantics=("parallel", "arbitrary"),
            vmem_limit_bytes=vmem_limit),
    )(x, w, v, b, c0)
    return out, pooled


# ----------------------------------------------------------------------------
# BiSRU forward (glue in JAX, compute in Pallas)
# ----------------------------------------------------------------------------
def bisru_forward(params, inp, hidden, *, pooling="mean"):
    """inp: (T, B) int32 token ids; hidden: (2*nlayers, B, H) initial c states.

    Returns (outp, emb) like the PyTorch module (eval mode: dropout = identity).
    """
    H = params["nhid"]
    T, B = inp.shape

    # Embedding lookup (gather) kept as JAX glue.
    # TODO(synk): training-mode dropout via pltpu.prng_random_bits if needed.
    emb = jnp.take(params["embedding"], inp, axis=0)           # (T, B, H) f32

    # Pad the batch to a sublane multiple so the in-kernel (Tc,B,D)->(Tc*B,D)
    # flatten and the MXU M dimension stay tile-aligned; padded rows are junk
    # and sliced off at the end (the recurrence is independent per batch row).
    B_pad = -(-B // 8) * 8
    x = emb.astype(jnp.bfloat16)                               # bf16 activations
    hid = hidden
    if B_pad != B:
        x = jnp.pad(x, ((0, 0), (0, B_pad - B), (0, 0)))
        hid = jnp.pad(hidden, ((0, 0), (0, B_pad - B), (0, 0)))

    nlayers = len(params["layers"])
    pooled = None
    for li, layer in enumerate(params["layers"]):
        skip_proj = x.shape[-1] != H
        c0 = jnp.stack([hid[2 * li], hid[2 * li + 1]], axis=0)  # (2, B_pad, H)
        compute_pool = (pooling == "mean") and (li == nlayers - 1)
        x, pooled = bisru_layer(x, layer["w"], layer["v"], layer["b"], c0,
                                skip_proj=skip_proj, compute_pool=compute_pool)

    if pooling == "mean":
        # Mean over time is fused into the last layer's kernel (f32 accumulation).
        outp = jnp.squeeze(pooled[:B])
    elif pooling == "max":
        outp = jnp.squeeze(jnp.max(x[:, :B].astype(jnp.float32), axis=0))
    else:  # 'all' / 'all-word'
        outp = jnp.transpose(x[:, :B].astype(jnp.float32), (1, 0, 2))
    return outp, emb


# ----------------------------------------------------------------------------
# Deterministic parameter construction (synthetic, mirrors __init__ shapes)
# ----------------------------------------------------------------------------
def make_params(key, *, ntoken, emb_size, nlayers, unk_idx=0):
    H = emb_size
    assert H % 128 == 0, "emb_size must be a multiple of 128 (pad it if not)"
    keys = jax.random.split(key, 1 + 4 * nlayers)
    # nn.Embedding(ntoken, emb_size), uniform(-0.1, 0.1), <unk> row zeroed.
    embedding = jax.random.uniform(keys[0], (ntoken, H), jnp.float32, -0.1, 0.1)
    embedding = embedding.at[unk_idx].set(0.0)

    layers = []
    kpos = 1
    for li in range(nlayers):
        d_in = H if li == 0 else 2 * H
        K = 3 if d_in == H else 4
        scale = 1.0 / jnp.sqrt(jnp.float32(d_in))
        # Per-direction weights; gate-major columns [x_tilde | f | r | (skip)].
        w_f = scale * jax.random.normal(keys[kpos + 0], (d_in, K * H), jnp.float32)
        w_b = scale * jax.random.normal(keys[kpos + 1], (d_in, K * H), jnp.float32)
        v_f = 0.1 * jax.random.normal(keys[kpos + 2], (2, H), jnp.float32)
        v_b = 0.1 * jax.random.normal(keys[kpos + 3], (2, H), jnp.float32)
        kpos += 4
        layers.append({
            # direction-major stacks; weights bf16 (MXU operands), rest f32.
            "w": jnp.stack([w_f, w_b], axis=0).astype(jnp.bfloat16),  # (2,d_in,K*H)
            "v": jnp.stack([v_f, v_b], axis=0),                       # (2,2,H)
            "b": jnp.zeros((2, 2, H), jnp.float32),                   # (2,2,H)
        })
    return {"embedding": embedding, "layers": layers, "nhid": H}


def init_hidden(nlayers, bsz, nhid):
    return jnp.zeros((nlayers * 2, bsz, nhid), jnp.float32)


# ----------------------------------------------------------------------------
if __name__ == "__main__":
    # config (small, lane-aligned hidden size)
    NTOKEN, EMB, NLAYERS = 50, 128, 2
    T, B = 8, 4
    POOLING = "mean"

    key = jax.random.PRNGKey(0)
    kp, ki = jax.random.split(key)
    params = make_params(kp, ntoken=NTOKEN, emb_size=EMB, nlayers=NLAYERS)

    inp = jax.random.randint(ki, (T, B), 0, NTOKEN, dtype=jnp.int32)
    hidden = init_hidden(NLAYERS, B, EMB)

    outp, emb = bisru_forward(params, inp, hidden, pooling=POOLING)
    outp = jax.block_until_ready(outp)
    emb = jax.block_until_ready(emb)

    assert outp.shape == (B, 2 * EMB), outp.shape
    assert emb.shape == (T, B, EMB), emb.shape
    assert jnp.all(jnp.isfinite(outp)) and jnp.all(jnp.isfinite(emb))
    print("KERNEL_OK")
</pallas_src>

<mosaic_0001>
module attributes {stable_mosaic.version = 11 : i64} {
  func.func @_bisru_dir_kernel(%arg0: i32, %arg1: i32, %arg2: memref<8x8x128xbf16, #tpu.memory_space<vmem>>, %arg3: memref<1x128x384xbf16, #tpu.memory_space<vmem>>, %arg4: memref<1x2x128xf32, #tpu.memory_space<vmem>>, %arg5: memref<1x2x128xf32, #tpu.memory_space<vmem>>, %arg6: memref<1x8x128xf32, #tpu.memory_space<vmem>>, %arg7: memref<8x8x128xbf16, #tpu.memory_space<vmem>>, %arg8: memref<8x128xf32, #tpu.memory_space<vmem>>, %arg9: memref<8x8x384xf32, #tpu.memory_space<vmem>>, %arg10: memref<8x128xf32, #tpu.memory_space<vmem>>) attributes {dimension_semantics = [#tpu.dimension_semantics<parallel>, #tpu.dimension_semantics<arbitrary>], iteration_bounds = array<i64: 2, 1>, scalar_prefetch = 0 : i64, scratch_operands = 2 : i64, tpu.core_type = #tpu.core_type<tc>, window_params = [{transform_indices = @transform_0, window_bounds = array<i64: 8, 8, 128>}, {transform_indices = @transform_1, window_bounds = array<i64: 1, 128, 384>}, {transform_indices = @transform_2, window_bounds = array<i64: 1, 2, 128>}, {transform_indices = @transform_3, window_bounds = array<i64: 1, 2, 128>}, {transform_indices = @transform_4, window_bounds = array<i64: 1, 8, 128>}, {transform_indices = @transform_5, window_bounds = array<i64: 8, 8, 128>}, {transform_indices = @transform_6, window_bounds = array<i64: 8, 128>}]} {
    %c0_i32 = arith.constant 0 : i32
    %0 = arith.cmpi eq, %arg1, %c0_i32 : i32
    %c0 = arith.constant 0 : index
    %c0_0 = arith.constant 0 : index
    %c0_1 = arith.constant 0 : index
    %1 = vector.load %arg2[%c0, %c0_0, %c0_1] : memref<8x8x128xbf16, #tpu.memory_space<vmem>>, vector<8x8x128xbf16>
    %2 = vector.shape_cast %1 : vector<8x8x128xbf16> to vector<64x128xbf16>
    %c0_2 = arith.constant 0 : index
    %c0_3 = arith.constant 0 : index
    %c0_4 = arith.constant 0 : index
    %3 = vector.load %arg3[%c0_2, %c0_3, %c0_4] : memref<1x128x384xbf16, #tpu.memory_space<vmem>>, vector<1x128x384xbf16>
    %4 = vector.shape_cast %3 : vector<1x128x384xbf16> to vector<128x384xbf16>
    %cst = arith.constant dense<0.000000e+00> : vector<64x384xf32>
    %5 = tpu.matmul %2, %4, %cst {dimension_numbers = #tpu.dot_dimension_numbers<[1], [0], [0], [1], [0, 0, 1, 1], [], []>} : vector<64x128xbf16>, vector<128x384xbf16>, vector<64x384xf32> -> vector<64x384xf32>
    %6 = vector.shape_cast %5 : vector<64x384xf32> to vector<8x8x384xf32>
    %c0_5 = arith.constant 0 : index
    %c0_6 = arith.constant 0 : index
    %c0_7 = arith.constant 0 : index
    %7 = vector.load %arg9[%c0_5, %c0_6, %c0_7] : memref<8x8x384xf32, #tpu.memory_space<vmem>>, vector<8x8x384xf32>
    tpu.vector_store %arg9[%c0_5, %c0_6, %c0_7], %6 {strides = array<i32>} : memref<8x8x384xf32, #tpu.memory_space<vmem>>, vector<8x8x384xf32>,
    %8 = arith.extui %0 : i1 to i32
    %c0_i32_8 = arith.constant 0 : i32
    %9 = arith.cmpi ne, %8, %c0_i32_8 : i32
    scf.if %9 {
      %c0_156 = arith.constant 0 : index
      %c0_157 = arith.constant 0 : index
      %c0_158 = arith.constant 0 : index
      %428 = vector.load %arg6[%c0_156, %c0_157, %c0_158] : memref<1x8x128xf32, #tpu.memory_space<vmem>>, vector<1x8x128xf32>
      %429 = vector.shape_cast %428 : vector<1x8x128xf32> to vector<8x128xf32>
      %c0_159 = arith.constant 0 : index
      %c0_160 = arith.constant 0 : index
      %430 = vector.load %arg10[%c0_159, %c0_160] : memref<8x128xf32, #tpu.memory_space<vmem>>, vector<8x128xf32>
      tpu.vector_store %arg10[%c0_159, %c0_160], %429 {strides = array<i32>} : memref<8x128xf32, #tpu.memory_space<vmem>>, vector<8x128xf32>,
      %cst_161 = arith.constant 0.000000e+00 : f32
      %431 = vector.broadcast %cst_161 : f32 to vector<8x128xf32>
      %c0_162 = arith.constant 0 : index
      %c0_163 = arith.constant 0 : index
      %432 = vector.load %arg8[%c0_162, %c0_163] : memref<8x128xf32, #tpu.memory_space<vmem>>, vector<8x128xf32>
      tpu.vector_store %arg8[%c0_162, %c0_163], %431 {strides = array<i32>} : memref<8x128xf32, #tpu.memory_space<vmem>>, vector<8x128xf32>,
    } else {
    }
    %c0_9 = arith.constant 0 : index
    %c0_10 = arith.constant 0 : index
    %c0_11 = arith.constant 0 : index
    %10 = vector.load %arg4[%c0_9, %c0_10, %c0_11] : memref<1x2x128xf32, #tpu.memory_space<vmem>>, vector<1x2x128xf32>
    %11 = vector.shape_cast %10 : vector<1x2x128xf32> to vector<2x128xf32>
    %c0_12 = arith.constant 0 : index
    %c0_13 = arith.constant 0 : index
    %c0_14 = arith.constant 0 : index
    %12 = vector.load %arg5[%c0_12, %c0_13, %c0_14] : memref<1x2x128xf32, #tpu.memory_space<vmem>>, vector<1x2x128xf32>
    %13 = vector.shape_cast %12 : vector<1x2x128xf32> to vector<2x128xf32>
    %14 = vector.extract_strided_slice %11 {offsets = [0, 0], sizes = [1, 128], strides = [1, 1]} : vector<2x128xf32> to vector<1x128xf32>
    %15 = vector.shape_cast %14 : vector<1x128xf32> to vector<1x128xf32>
    %16 = vector.broadcast %15 : vector<1x128xf32> to vector<8x128xf32>
    %17 = vector.extract_strided_slice %11 {offsets = [1, 0], sizes = [1, 128], strides = [1, 1]} : vector<2x128xf32> to vector<1x128xf32>
    %18 = vector.shape_cast %17 : vector<1x128xf32> to vector<1x128xf32>
    %19 = vector.broadcast %18 : vector<1x128xf32> to vector<8x128xf32>
    %20 = vector.extract_strided_slice %13 {offsets = [0, 0], sizes = [1, 128], strides = [1, 1]} : vector<2x128xf32> to vector<1x128xf32>
    %21 = vector.shape_cast %20 : vector<1x128xf32> to vector<1x128xf32>
    %22 = vector.broadcast %21 : vector<1x128xf32> to vector<8x128xf32>
    %23 = vector.extract_strided_slice %13 {offsets = [1, 0], sizes = [1, 128], strides = [1, 1]} : vector<2x128xf32> to vector<1x128xf32>
    %24 = vector.shape_cast %23 : vector<1x128xf32> to vector<1x128xf32>
    %25 = vector.broadcast %24 : vector<1x128xf32> to vector<8x128xf32>
    %c0_15 = arith.constant 0 : index
    %c0_16 = arith.constant 0 : index
    %26 = vector.load %arg10[%c0_15, %c0_16] : memref<8x128xf32, #tpu.memory_space<vmem>>, vector<8x128xf32>
    %c0_i32_17 = arith.constant 0 : i32
    %c7_i32 = arith.constant 7 : i32
    %27 = arith.muli %arg0, %c7_i32 : i32
    %c2_i32 = arith.constant 2 : i32
    %28 = arith.muli %c2_i32, %arg0 : i32
    %c1_i32 = arith.constant 1 : i32
    %29 = arith.subi %c1_i32, %28 : i32
    %30 = arith.muli %29, %c0_i32_17 : i32
    %31 = arith.addi %27, %30 : i32
    %32 = arith.index_cast %31 : i32 to index
    %c0_18 = arith.constant 0 : index
    %c0_19 = arith.constant 0 : index
    %33 = vector.load %arg9[%32, %c0_18, %c0_19] : memref<8x8x384xf32, #tpu.memory_space<vmem>>, vector<1x8x384xf32>
    %34 = vector.shape_cast %33 : vector<1x8x384xf32> to vector<8x384xf32>
    %35 = vector.extract_strided_slice %34 {offsets = [0, 0], sizes = [8, 128], strides = [1, 1]} : vector<8x384xf32> to vector<8x128xf32>
    %36 = vector.extract_strided_slice %34 {offsets = [0, 128], sizes = [8, 128], strides = [1, 1]} : vector<8x384xf32> to vector<8x128xf32>
    %37 = vector.extract_strided_slice %34 {offsets = [0, 256], sizes = [8, 128], strides = [1, 1]} : vector<8x384xf32> to vector<8x128xf32>
    %38 = arith.index_cast %31 : i32 to index
    %c0_20 = arith.constant 0 : index
    %c0_21 = arith.constant 0 : index
    %39 = vector.load %arg2[%38, %c0_20, %c0_21] : memref<8x8x128xbf16, #tpu.memory_space<vmem>>, vector<1x8x128xbf16>
    %40 = vector.shape_cast %39 : vector<1x8x128xbf16> to vector<8x128xbf16>
    %41 = arith.extf %40 : vector<8x128xbf16> to vector<8x128xf32>
    %42 = arith.mulf %16, %26 : vector<8x128xf32>
    %43 = arith.addf %36, %42 : vector<8x128xf32>
    %44 = arith.addf %43, %22 : vector<8x128xf32>
    %cst_22 = arith.constant 5.000000e-01 : f32
    %45 = vector.broadcast %cst_22 : f32 to vector<8x128xf32>
    %46 = arith.mulf %45, %44 : vector<8x128xf32>
    %47 = math.tanh %46 : vector<8x128xf32>
    %cst_23 = arith.constant 5.000000e-01 : f32
    %48 = vector.broadcast %cst_23 : f32 to vector<8x128xf32>
    %49 = arith.mulf %48, %47 : vector<8x128xf32>
    %cst_24 = arith.constant 5.000000e-01 : f32
    %50 = vector.broadcast %cst_24 : f32 to vector<8x128xf32>
    %51 = arith.addf %49, %50 : vector<8x128xf32>
    %52 = arith.mulf %51, %26 : vector<8x128xf32>
    %cst_25 = arith.constant 1.000000e+00 : f32
    %53 = vector.broadcast %cst_25 : f32 to vector<8x128xf32>
    %54 = arith.subf %53, %51 : vector<8x128xf32>
    %55 = arith.mulf %54, %35 : vector<8x128xf32>
    %56 = arith.addf %52, %55 : vector<8x128xf32>
    %57 = arith.mulf %19, %26 : vector<8x128xf32>
    %58 = arith.addf %37, %57 : vector<8x128xf32>
    %59 = arith.addf %58, %25 : vector<8x128xf32>
    %cst_26 = arith.constant 5.000000e-01 : f32
    %60 = vector.broadcast %cst_26 : f32 to vector<8x128xf32>
    %61 = arith.mulf %60, %59 : vector<8x128xf32>
    %62 = math.tanh %61 : vector<8x128xf32>
    %cst_27 = arith.constant 5.000000e-01 : f32
    %63 = vector.broadcast %cst_27 : f32 to vector<8x128xf32>
    %64 = arith.mulf %63, %62 : vector<8x128xf32>
    %cst_28 = arith.constant 5.000000e-01 : f32
    %65 = vector.broadcast %cst_28 : f32 to vector<8x128xf32>
    %66 = arith.addf %64, %65 : vector<8x128xf32>
    %67 = arith.mulf %66, %56 : vector<8x128xf32>
    %cst_29 = arith.constant 1.000000e+00 : f32
    %68 = vector.broadcast %cst_29 : f32 to vector<8x128xf32>
    %69 = arith.subf %68, %66 : vector<8x128xf32>
    %70 = arith.mulf %69, %41 : vector<8x128xf32>
    %71 = arith.addf %67, %70 : vector<8x128xf32>
    %72 = arith.truncf %71 : vector<8x128xf32> to vector<8x128xbf16>
    %73 = arith.index_cast %31 : i32 to index
    %c0_30 = arith.constant 0 : index
    %c0_31 = arith.constant 0 : index
    %74 = vector.load %arg7[%73, %c0_30, %c0_31] : memref<8x8x128xbf16, #tpu.memory_space<vmem>>, vector<1x8x128xbf16>
    %75 = vector.shape_cast %74 : vector<1x8x128xbf16> to vector<8x128xbf16>
    %76 = vector.shape_cast %72 : vector<8x128xbf16> to vector<1x8x128xbf16>
    tpu.vector_store %arg7[%73, %c0_30, %c0_31], %76 {strides = array<i32>} : memref<8x8x128xbf16, #tpu.memory_space<vmem>>, vector<1x8x128xbf16>,
    %c1_i32_32 = arith.constant 1 : i32
    %c7_i32_33 = arith.constant 7 : i32
    %77 = arith.muli %arg0, %c7_i32_33 : i32
    %c2_i32_34 = arith.constant 2 : i32
    %78 = arith.muli %c2_i32_34, %arg0 : i32
    %c1_i32_35 = arith.constant 1 : i32
    %79 = arith.subi %c1_i32_35, %78 : i32
    %80 = arith.muli %79, %c1_i32_32 : i32
    %81 = arith.addi %77, %80 : i32
    %82 = arith.index_cast %81 : i32 to index
    %c0_36 = arith.constant 0 : index
    %c0_37 = arith.constant 0 : index
    %83 = vector.load %arg9[%82, %c0_36, %c0_37] : memref<8x8x384xf32, #tpu.memory_space<vmem>>, vector<1x8x384xf32>
    %84 = vector.shape_cast %83 : vector<1x8x384xf32> to vector<8x384xf32>
    %85 = vector.extract_strided_slice %84 {offsets = [0, 0], sizes = [8, 128], strides = [1, 1]} : vector<8x384xf32> to vector<8x128xf32>
    %86 = vector.extract_strided_slice %84 {offsets = [0, 128], sizes = [8, 128], strides = [1, 1]} : vector<8x384xf32> to vector<8x128xf32>
    %87 = vector.extract_strided_slice %84 {offsets = [0, 256], sizes = [8, 128], strides = [1, 1]} : vector<8x384xf32> to vector<8x128xf32>
    %88 = arith.index_cast %81 : i32 to index
    %c0_38 = arith.constant 0 : index
    %c0_39 = arith.constant 0 : index
    %89 = vector.load %arg2[%88, %c0_38, %c0_39] : memref<8x8x128xbf16, #tpu.memory_space<vmem>>, vector<1x8x128xbf16>
    %90 = vector.shape_cast %89 : vector<1x8x128xbf16> to vector<8x128xbf16>
    %91 = arith.extf %90 : vector<8x128xbf16> to vector<8x128xf32>
    %92 = arith.mulf %16, %56 : vector<8x128xf32>
    %93 = arith.addf %86, %92 : vector<8x128xf32>
    %94 = arith.addf %93, %22 : vector<8x128xf32>
    %cst_40 = arith.constant 5.000000e-01 : f32
    %95 = vector.broadcast %cst_40 : f32 to vector<8x128xf32>
    %96 = arith.mulf %95, %94 : vector<8x128xf32>
    %97 = math.tanh %96 : vector<8x128xf32>
    %cst_41 = arith.constant 5.000000e-01 : f32
    %98 = vector.broadcast %cst_41 : f32 to vector<8x128xf32>
    %99 = arith.mulf %98, %97 : vector<8x128xf32>
    %cst_42 = arith.constant 5.000000e-01 : f32
    %100 = vector.broadcast %cst_42 : f32 to vector<8x128xf32>
    %101 = arith.addf %99, %100 : vector<8x128xf32>
    %102 = arith.mulf %101, %56 : vector<8x128xf32>
    %cst_43 = arith.constant 1.000000e+00 : f32
    %103 = vector.broadcast %cst_43 : f32 to vector<8x128xf32>
    %104 = arith.subf %103, %101 : vector<8x128xf32>
    %105 = arith.mulf %104, %85 : vector<8x128xf32>
    %106 = arith.addf %102, %105 : vector<8x128xf32>
    %107 = arith.mulf %19, %56 : vector<8x128xf32>
    %108 = arith.addf %87, %107 : vector<8x128xf32>
    %109 = arith.addf %108, %25 : vector<8x128xf32>
    %cst_44 = arith.constant 5.000000e-01 : f32
    %110 = vector.broadcast %cst_44 : f32 to vector<8x128xf32>
    %111 = arith.mulf %110, %109 : vector<8x128xf32>
    %112 = math.tanh %111 : vector<8x128xf32>
    %cst_45 = arith.constant 5.000000e-01 : f32
    %113 = vector.broadcast %cst_45 : f32 to vector<8x128xf32>
    %114 = arith.mulf %113, %112 : vector<8x128xf32>
    %cst_46 = arith.constant 5.000000e-01 : f32
    %115 = vector.broadcast %cst_46 : f32 to vector<8x128xf32>
    %116 = arith.addf %114, %115 : vector<8x128xf32>
    %117 = arith.mulf %116, %106 : vector<8x128xf32>
    %cst_47 = arith.constant 1.000000e+00 : f32
    %118 = vector.broadcast %cst_47 : f32 to vector<8x128xf32>
    %119 = arith.subf %118, %116 : vector<8x128xf32>
    %120 = arith.mulf %119, %91 : vector<8x128xf32>
    %121 = arith.addf %117, %120 : vector<8x128xf32>
    %122 = arith.truncf %121 : vector<8x128xf32> to vector<8x128xbf16>
    %123 = arith.index_cast %81 : i32 to index
    %c0_48 = arith.constant 0 : index
    %c0_49 = arith.constant 0 : index
    %124 = vector.load %arg7[%123, %c0_48, %c0_49] : memref<8x8x128xbf16, #tpu.memory_space<vmem>>, vector<1x8x128xbf16>
    %125 = vector.shape_cast %124 : vector<1x8x128xbf16> to vector<8x128xbf16>
    %126 = vector.shape_cast %122 : vector<8x128xbf16> to vector<1x8x128xbf16>
    tpu.vector_store %arg7[%123, %c0_48, %c0_49], %126 {strides = array<i32>} : memref<8x8x128xbf16, #tpu.memory_space<vmem>>, vector<1x8x128xbf16>,
    %c2_i32_50 = arith.constant 2 : i32
    %c7_i32_51 = arith.constant 7 : i32
    %127 = arith.muli %arg0, %c7_i32_51 : i32
    %c2_i32_52 = arith.constant 2 : i32
    %128 = arith.muli %c2_i32_52, %arg0 : i32
    %c1_i32_53 = arith.constant 1 : i32
    %129 = arith.subi %c1_i32_53, %128 : i32
    %130 = arith.muli %129, %c2_i32_50 : i32
    %131 = arith.addi %127, %130 : i32
    %132 = arith.index_cast %131 : i32 to index
    %c0_54 = arith.constant 0 : index
    %c0_55 = arith.constant 0 : index
    %133 = vector.load %arg9[%132, %c0_54, %c0_55] : memref<8x8x384xf32, #tpu.memory_space<vmem>>, vector<1x8x384xf32>
    %134 = vector.shape_cast %133 : vector<1x8x384xf32> to vector<8x384xf32>
    %135 = vector.extract_strided_slice %134 {offsets = [0, 0], sizes = [8, 128], strides = [1, 1]} : vector<8x384xf32> to vector<8x128xf32>
    %136 = vector.extract_strided_slice %134 {offsets = [0, 128], sizes = [8, 128], strides = [1, 1]} : vector<8x384xf32> to vector<8x128xf32>
    %137 = vector.extract_strided_slice %134 {offsets = [0, 256], sizes = [8, 128], strides = [1, 1]} : vector<8x384xf32> to vector<8x128xf32>
    %138 = arith.index_cast %131 : i32 to index
    %c0_56 = arith.constant 0 : index
    %c0_57 = arith.constant 0 : index
    %139 = vector.load %arg2[%138, %c0_56, %c0_57] : memref<8x8x128xbf16, #tpu.memory_space<vmem>>, vector<1x8x128xbf16>
    %140 = vector.shape_cast %139 : vector<1x8x128xbf16> to vector<8x128xbf16>
    %141 = arith.extf %140 : vector<8x128xbf16> to vector<8x128xf32>
    %142 = arith.mulf %16, %106 : vector<8x128xf32>
    %143 = arith.addf %136, %142 : vector<8x128xf32>
    %144 = arith.addf %143, %22 : vector<8x128xf32>
    %cst_58 = arith.constant 5.000000e-01 : f32
    %145 = vector.broadcast %cst_58 : f32 to vector<8x128xf32>
    %146 = arith.mulf %145, %144 : vector<8x128xf32>
    %147 = math.tanh %146 : vector<8x128xf32>
    %cst_59 = arith.constant 5.000000e-01 : f32
    %148 = vector.broadcast %cst_59 : f32 to vector<8x128xf32>
    %149 = arith.mulf %148, %147 : vector<8x128xf32>
    %cst_60 = arith.constant 5.000000e-01 : f32
    %150 = vector.broadcast %cst_60 : f32 to vector<8x128xf32>
    %151 = arith.addf %149, %150 : vector<8x128xf32>
    %152 = arith.mulf %151, %106 : vector<8x128xf32>
    %cst_61 = arith.constant 1.000000e+00 : f32
    %153 = vector.broadcast %cst_61 : f32 to vector<8x128xf32>
    %154 = arith.subf %153, %151 : vector<8x128xf32>
    %155 = arith.mulf %154, %135 : vector<8x128xf32>
    %156 = arith.addf %152, %155 : vector<8x128xf32>
    %157 = arith.mulf %19, %106 : vector<8x128xf32>
    %158 = arith.addf %137, %157 : vector<8x128xf32>
    %159 = arith.addf %158, %25 : vector<8x128xf32>
    %cst_62 = arith.constant 5.000000e-01 : f32
    %160 = vector.broadcast %cst_62 : f32 to vector<8x128xf32>
    %161 = arith.mulf %160, %159 : vector<8x128xf32>
    %162 = math.tanh %161 : vector<8x128xf32>
    %cst_63 = arith.constant 5.000000e-01 : f32
    %163 = vector.broadcast %cst_63 : f32 to vector<8x128xf32>
    %164 = arith.mulf %163, %162 : vector<8x128xf32>
    %cst_64 = arith.constant 5.000000e-01 : f32
    %165 = vector.broadcast %cst_64 : f32 to vector<8x128xf32>
    %166 = arith.addf %164, %165 : vector<8x128xf32>
    %167 = arith.mulf %166, %156 : vector<8x128xf32>
    %cst_65 = arith.constant 1.000000e+00 : f32
    %168 = vector.broadcast %cst_65 : f32 to vector<8x128xf32>
    %169 = arith.subf %168, %166 : vector<8x128xf32>
    %170 = arith.mulf %169, %141 : vector<8x128xf32>
    %171 = arith.addf %167, %170 : vector<8x128xf32>
    %172 = arith.truncf %171 : vector<8x128xf32> to vector<8x128xbf16>
    %173 = arith.index_cast %131 : i32 to index
    %c0_66 = arith.constant 0 : index
    %c0_67 = arith.constant 0 : index
    %174 = vector.load %arg7[%173, %c0_66, %c0_67] : memref<8x8x128xbf16, #tpu.memory_space<vmem>>, vector<1x8x128xbf16>
    %175 = vector.shape_cast %174 : vector<1x8x128xbf16> to vector<8x128xbf16>
    %176 = vector.shape_cast %172 : vector<8x128xbf16> to vector<1x8x128xbf16>
    tpu.vector_store %arg7[%173, %c0_66, %c0_67], %176 {strides = array<i32>} : memref<8x8x128xbf16, #tpu.memory_space<vmem>>, vector<1x8x128xbf16>,
    %c3_i32 = arith.constant 3 : i32
    %c7_i32_68 = arith.constant 7 : i32
    %177 = arith.muli %arg0, %c7_i32_68 : i32
    %c2_i32_69 = arith.constant 2 : i32
    %178 = arith.muli %c2_i32_69, %arg0 : i32
    %c1_i32_70 = arith.constant 1 : i32
    %179 = arith.subi %c1_i32_70, %178 : i32
    %180 = arith.muli %179, %c3_i32 : i32
    %181 = arith.addi %177, %180 : i32
    %182 = arith.index_cast %181 : i32 to index
    %c0_71 = arith.constant 0 : index
    %c0_72 = arith.constant 0 : index
    %183 = vector.load %arg9[%182, %c0_71, %c0_72] : memref<8x8x384xf32, #tpu.memory_space<vmem>>, vector<1x8x384xf32>
    %184 = vector.shape_cast %183 : vector<1x8x384xf32> to vector<8x384xf32>
    %185 = vector.extract_strided_slice %184 {offsets = [0, 0], sizes = [8, 128], strides = [1, 1]} : vector<8x384xf32> to vector<8x128xf32>
    %186 = vector.extract_strided_slice %184 {offsets = [0, 128], sizes = [8, 128], strides = [1, 1]} : vector<8x384xf32> to vector<8x128xf32>
    %187 = vector.extract_strided_slice %184 {offsets = [0, 256], sizes = [8, 128], strides = [1, 1]} : vector<8x384xf32> to vector<8x128xf32>
    %188 = arith.index_cast %181 : i32 to index
    %c0_73 = arith.constant 0 : index
    %c0_74 = arith.constant 0 : index
    %189 = vector.load %arg2[%188, %c0_73, %c0_74] : memref<8x8x128xbf16, #tpu.memory_space<vmem>>, vector<1x8x128xbf16>
    %190 = vector.shape_cast %189 : vector<1x8x128xbf16> to vector<8x128xbf16>
    %191 = arith.extf %190 : vector<8x128xbf16> to vector<8x128xf32>
    %192 = arith.mulf %16, %156 : vector<8x128xf32>
    %193 = arith.addf %186, %192 : vector<8x128xf32>
    %194 = arith.addf %193, %22 : vector<8x128xf32>
    %cst_75 = arith.constant 5.000000e-01 : f32
    %195 = vector.broadcast %cst_75 : f32 to vector<8x128xf32>
    %196 = arith.mulf %195, %194 : vector<8x128xf32>
    %197 = math.tanh %196 : vector<8x128xf32>
    %cst_76 = arith.constant 5.000000e-01 : f32
    %198 = vector.broadcast %cst_76 : f32 to vector<8x128xf32>
    %199 = arith.mulf %198, %197 : vector<8x128xf32>
    %cst_77 = arith.constant 5.000000e-01 : f32
    %200 = vector.broadcast %cst_77 : f32 to vector<8x128xf32>
    %201 = arith.addf %199, %200 : vector<8x128xf32>
    %202 = arith.mulf %201, %156 : vector<8x128xf32>
    %cst_78 = arith.constant 1.000000e+00 : f32
    %203 = vector.broadcast %cst_78 : f32 to vector<8x128xf32>
    %204 = arith.subf %203, %201 : vector<8x128xf32>
    %205 = arith.mulf %204, %185 : vector<8x128xf32>
    %206 = arith.addf %202, %205 : vector<8x128xf32>
    %207 = arith.mulf %19, %156 : vector<8x128xf32>
    %208 = arith.addf %187, %207 : vector<8x128xf32>
    %209 = arith.addf %208, %25 : vector<8x128xf32>
    %cst_79 = arith.constant 5.000000e-01 : f32
    %210 = vector.broadcast %cst_79 : f32 to vector<8x128xf32>
    %211 = arith.mulf %210, %209 : vector<8x128xf32>
    %212 = math.tanh %211 : vector<8x128xf32>
    %cst_80 = arith.constant 5.000000e-01 : f32
    %213 = vector.broadcast %cst_80 : f32 to vector<8x128xf32>
    %214 = arith.mulf %213, %212 : vector<8x128xf32>
    %cst_81 = arith.constant 5.000000e-01 : f32
    %215 = vector.broadcast %cst_81 : f32 to vector<8x128xf32>
    %216 = arith.addf %214, %215 : vector<8x128xf32>
    %217 = arith.mulf %216, %206 : vector<8x128xf32>
    %cst_82 = arith.constant 1.000000e+00 : f32
    %218 = vector.broadcast %cst_82 : f32 to vector<8x128xf32>
    %219 = arith.subf %218, %216 : vector<8x128xf32>
    %220 = arith.mulf %219, %191 : vector<8x128xf32>
    %221 = arith.addf %217, %220 : vector<8x128xf32>
    %222 = arith.truncf %221 : vector<8x128xf32> to vector<8x128xbf16>
    %223 = arith.index_cast %181 : i32 to index
    %c0_83 = arith.constant 0 : index
    %c0_84 = arith.constant 0 : index
    %224 = vector.load %arg7[%223, %c0_83, %c0_84] : memref<8x8x128xbf16, #tpu.memory_space<vmem>>, vector<1x8x128xbf16>
    %225 = vector.shape_cast %224 : vector<1x8x128xbf16> to vector<8x128xbf16>
    %226 = vector.shape_cast %222 : vector<8x128xbf16> to vector<1x8x128xbf16>
    tpu.vector_store %arg7[%223, %c0_83, %c0_84], %226 {strides = array<i32>} : memref<8x8x128xbf16, #tpu.memory_space<vmem>>, vector<1x8x128xbf16>,
    %c4_i32 = arith.constant 4 : i32
    %c7_i32_85 = arith.constant 7 : i32
    %227 = arith.muli %arg0, %c7_i32_85 : i32
    %c2_i32_86 = arith.constant 2 : i32
    %228 = arith.muli %c2_i32_86, %arg0 : i32
    %c1_i32_87 = arith.constant 1 : i32
    %229 = arith.subi %c1_i32_87, %228 : i32
    %230 = arith.muli %229, %c4_i32 : i32
    %231 = arith.addi %227, %230 : i32
    %232 = arith.index_cast %231 : i32 to index
    %c0_88 = arith.constant 0 : index
    %c0_89 = arith.constant 0 : index
    %233 = vector.load %arg9[%232, %c0_88, %c0_89] : memref<8x8x384xf32, #tpu.memory_space<vmem>>, vector<1x8x384xf32>
    %234 = vector.shape_cast %233 : vector<1x8x384xf32> to vector<8x384xf32>
    %235 = vector.extract_strided_slice %234 {offsets = [0, 0], sizes = [8, 128], strides = [1, 1]} : vector<8x384xf32> to vector<8x128xf32>
    %236 = vector.extract_strided_slice %234 {offsets = [0, 128], sizes = [8, 128], strides = [1, 1]} : vector<8x384xf32> to vector<8x128xf32>
    %237 = vector.extract_strided_slice %234 {offsets = [0, 256], sizes = [8, 128], strides = [1, 1]} : vector<8x384xf32> to vector<8x128xf32>
    %238 = arith.index_cast %231 : i32 to index
    %c0_90 = arith.constant 0 : index
    %c0_91 = arith.constant 0 : index
    %239 = vector.load %arg2[%238, %c0_90, %c0_91] : memref<8x8x128xbf16, #tpu.memory_space<vmem>>, vector<1x8x128xbf16>
    %240 = vector.shape_cast %239 : vector<1x8x128xbf16> to vector<8x128xbf16>
    %241 = arith.extf %240 : vector<8x128xbf16> to vector<8x128xf32>
    %242 = arith.mulf %16, %206 : vector<8x128xf32>
    %243 = arith.addf %236, %242 : vector<8x128xf32>
    %244 = arith.addf %243, %22 : vector<8x128xf32>
    %cst_92 = arith.constant 5.000000e-01 : f32
    %245 = vector.broadcast %cst_92 : f32 to vector<8x128xf32>
    %246 = arith.mulf %245, %244 : vector<8x128xf32>
    %247 = math.tanh %246 : vector<8x128xf32>
    %cst_93 = arith.constant 5.000000e-01 : f32
    %248 = vector.broadcast %cst_93 : f32 to vector<8x128xf32>
    %249 = arith.mulf %248, %247 : vector<8x128xf32>
    %cst_94 = arith.constant 5.000000e-01 : f32
    %250 = vector.broadcast %cst_94 : f32 to vector<8x128xf32>
    %251 = arith.addf %249, %250 : vector<8x128xf32>
    %252 = arith.mulf %251, %206 : vector<8x128xf32>
    %cst_95 = arith.constant 1.000000e+00 : f32
    %253 = vector.broadcast %cst_95 : f32 to vector<8x128xf32>
    %254 = arith.subf %253, %251 : vector<8x128xf32>
    %255 = arith.mulf %254, %235 : vector<8x128xf32>
    %256 = arith.addf %252, %255 : vector<8x128xf32>
    %257 = arith.mulf %19, %206 : vector<8x128xf32>
    %258 = arith.addf %237, %257 : vector<8x128xf32>
    %259 = arith.addf %258, %25 : vector<8x128xf32>
    %cst_96 = arith.constant 5.000000e-01 : f32
    %260 = vector.broadcast %cst_96 : f32 to vector<8x128xf32>
    %261 = arith.mulf %260, %259 : vector<8x128xf32>
    %262 = math.tanh %261 : vector<8x128xf32>
    %cst_97 = arith.constant 5.000000e-01 : f32
    %263 = vector.broadcast %cst_97 : f32 to vector<8x128xf32>
    %264 = arith.mulf %263, %262 : vector<8x128xf32>
    %cst_98 = arith.constant 5.000000e-01 : f32
    %265 = vector.broadcast %cst_98 : f32 to vector<8x128xf32>
    %266 = arith.addf %264, %265 : vector<8x128xf32>
    %267 = arith.mulf %266, %256 : vector<8x128xf32>
    %cst_99 = arith.constant 1.000000e+00 : f32
    %268 = vector.broadcast %cst_99 : f32 to vector<8x128xf32>
    %269 = arith.subf %268, %266 : vector<8x128xf32>
    %270 = arith.mulf %269, %241 : vector<8x128xf32>
    %271 = arith.addf %267, %270 : vector<8x128xf32>
    %272 = arith.truncf %271 : vector<8x128xf32> to vector<8x128xbf16>
    %273 = arith.index_cast %231 : i32 to index
    %c0_100 = arith.constant 0 : index
    %c0_101 = arith.constant 0 : index
    %274 = vector.load %arg7[%273, %c0_100, %c0_101] : memref<8x8x128xbf16, #tpu.memory_space<vmem>>, vector<1x8x128xbf16>
    %275 = vector.shape_cast %274 : vector<1x8x128xbf16> to vector<8x128xbf16>
    %276 = vector.shape_cast %272 : vector<8x128xbf16> to vector<1x8x128xbf16>
    tpu.vector_store %arg7[%273, %c0_100, %c0_101], %276 {strides = array<i32>} : memref<8x8x128xbf16, #tpu.memory_space<vmem>>, vector<1x8x128xbf16>,
    %c5_i32 = arith.constant 5 : i32
    %c7_i32_102 = arith.constant 7 : i32
    %277 = arith.muli %arg0, %c7_i32_102 : i32
    %c2_i32_103 = arith.constant 2 : i32
    %278 = arith.muli %c2_i32_103, %arg0 : i32
    %c1_i32_104 = arith.constant 1 : i32
    %279 = arith.subi %c1_i32_104, %278 : i32
    %280 = arith.muli %279, %c5_i32 : i32
    %281 = arith.addi %277, %280 : i32
    %282 = arith.index_cast %281 : i32 to index
    %c0_105 = arith.constant 0 : index
    %c0_106 = arith.constant 0 : index
    %283 = vector.load %arg9[%282, %c0_105, %c0_106] : memref<8x8x384xf32, #tpu.memory_space<vmem>>, vector<1x8x384xf32>
    %284 = vector.shape_cast %283 : vector<1x8x384xf32> to vector<8x384xf32>
    %285 = vector.extract_strided_slice %284 {offsets = [0, 0], sizes = [8, 128], strides = [1, 1]} : vector<8x384xf32> to vector<8x128xf32>
    %286 = vector.extract_strided_slice %284 {offsets = [0, 128], sizes = [8, 128], strides = [1, 1]} : vector<8x384xf32> to vector<8x128xf32>
    %287 = vector.extract_strided_slice %284 {offsets = [0, 256], sizes = [8, 128], strides = [1, 1]} : vector<8x384xf32> to vector<8x128xf32>
    %288 = arith.index_cast %281 : i32 to index
    %c0_107 = arith.constant 0 : index
    %c0_108 = arith.constant 0 : index
    %289 = vector.load %arg2[%288, %c0_107, %c0_108] : memref<8x8x128xbf16, #tpu.memory_space<vmem>>, vector<1x8x128xbf16>
    %290 = vector.shape_cast %289 : vector<1x8x128xbf16> to vector<8x128xbf16>
    %291 = arith.extf %290 : vector<8x128xbf16> to vector<8x128xf32>
    %292 = arith.mulf %16, %256 : vector<8x128xf32>
    %293 = arith.addf %286, %292 : vector<8x128xf32>
    %294 = arith.addf %293, %22 : vector<8x128xf32>
    %cst_109 = arith.constant 5.000000e-01 : f32
    %295 = vector.broadcast %cst_109 : f32 to vector<8x128xf32>
    %296 = arith.mulf %295, %294 : vector<8x128xf32>
    %297 = math.tanh %296 : vector<8x128xf32>
    %cst_110 = arith.constant 5.000000e-01 : f32
    %298 = vector.broadcast %cst_110 : f32 to vector<8x128xf32>
    %299 = arith.mulf %298, %297 : vector<8x128xf32>
    %cst_111 = arith.constant 5.000000e-01 : f32
    %300 = vector.broadcast %cst_111 : f32 to vector<8x128xf32>
    %301 = arith.addf %299, %300 : vector<8x128xf32>
    %302 = arith.mulf %301, %256 : vector<8x128xf32>
    %cst_112 = arith.constant 1.000000e+00 : f32
    %303 = vector.broadcast %cst_112 : f32 to vector<8x128xf32>
    %304 = arith.subf %303, %301 : vector<8x128xf32>
    %305 = arith.mulf %304, %285 : vector<8x128xf32>
    %306 = arith.addf %302, %305 : vector<8x128xf32>
    %307 = arith.mulf %19, %256 : vector<8x128xf32>
    %308 = arith.addf %287, %307 : vector<8x128xf32>
    %309 = arith.addf %308, %25 : vector<8x128xf32>
    %cst_113 = arith.constant 5.000000e-01 : f32
    %310 = vector.broadcast %cst_113 : f32 to vector<8x128xf32>
    %311 = arith.mulf %310, %309 : vector<8x128xf32>
    %312 = math.tanh %311 : vector<8x128xf32>
    %cst_114 = arith.constant 5.000000e-01 : f32
    %313 = vector.broadcast %cst_114 : f32 to vector<8x128xf32>
    %314 = arith.mulf %313, %312 : vector<8x128xf32>
    %cst_115 = arith.constant 5.000000e-01 : f32
    %315 = vector.broadcast %cst_115 : f32 to vector<8x128xf32>
    %316 = arith.addf %314, %315 : vector<8x128xf32>
    %317 = arith.mulf %316, %306 : vector<8x128xf32>
    %cst_116 = arith.constant 1.000000e+00 : f32
    %318 = vector.broadcast %cst_116 : f32 to vector<8x128xf32>
    %319 = arith.subf %318, %316 : vector<8x128xf32>
    %320 = arith.mulf %319, %291 : vector<8x128xf32>
    %321 = arith.addf %317, %320 : vector<8x128xf32>
    %322 = arith.truncf %321 : vector<8x128xf32> to vector<8x128xbf16>
    %323 = arith.index_cast %281 : i32 to index
    %c0_117 = arith.constant 0 : index
    %c0_118 = arith.constant 0 : index
    %324 = vector.load %arg7[%323, %c0_117, %c0_118] : memref<8x8x128xbf16, #tpu.memory_space<vmem>>, vector<1x8x128xbf16>
    %325 = vector.shape_cast %324 : vector<1x8x128xbf16> to vector<8x128xbf16>
    %326 = vector.shape_cast %322 : vector<8x128xbf16> to vector<1x8x128xbf16>
    tpu.vector_store %arg7[%323, %c0_117, %c0_118], %326 {strides = array<i32>} : memref<8x8x128xbf16, #tpu.memory_space<vmem>>, vector<1x8x128xbf16>,
    %c6_i32 = arith.constant 6 : i32
    %c7_i32_119 = arith.constant 7 : i32
    %327 = arith.muli %arg0, %c7_i32_119 : i32
    %c2_i32_120 = arith.constant 2 : i32
    %328 = arith.muli %c2_i32_120, %arg0 : i32
    %c1_i32_121 = arith.constant 1 : i32
    %329 = arith.subi %c1_i32_121, %328 : i32
    %330 = arith.muli %329, %c6_i32 : i32
    %331 = arith.addi %327, %330 : i32
    %332 = arith.index_cast %331 : i32 to index
    %c0_122 = arith.constant 0 : index
    %c0_123 = arith.constant 0 : index
    %333 = vector.load %arg9[%332, %c0_122, %c0_123] : memref<8x8x384xf32, #tpu.memory_space<vmem>>, vector<1x8x384xf32>
    %334 = vector.shape_cast %333 : vector<1x8x384xf32> to vector<8x384xf32>
    %335 = vector.extract_strided_slice %334 {offsets = [0, 0], sizes = [8, 128], strides = [1, 1]} : vector<8x384xf32> to vector<8x128xf32>
    %336 = vector.extract_strided_slice %334 {offsets = [0, 128], sizes = [8, 128], strides = [1, 1]} : vector<8x384xf32> to vector<8x128xf32>
    %337 = vector.extract_strided_slice %334 {offsets = [0, 256], sizes = [8, 128], strides = [1, 1]} : vector<8x384xf32> to vector<8x128xf32>
    %338 = arith.index_cast %331 : i32 to index
    %c0_124 = arith.constant 0 : index
    %c0_125 = arith.constant 0 : index
    %339 = vector.load %arg2[%338, %c0_124, %c0_125] : memref<8x8x128xbf16, #tpu.memory_space<vmem>>, vector<1x8x128xbf16>
    %340 = vector.shape_cast %339 : vector<1x8x128xbf16> to vector<8x128xbf16>
    %341 = arith.extf %340 : vector<8x128xbf16> to vector<8x128xf32>
    %342 = arith.mulf %16, %306 : vector<8x128xf32>
    %343 = arith.addf %336, %342 : vector<8x128xf32>
    %344 = arith.addf %343, %22 : vector<8x128xf32>
    %cst_126 = arith.constant 5.000000e-01 : f32
    %345 = vector.broadcast %cst_126 : f32 to vector<8x128xf32>
    %346 = arith.mulf %345, %344 : vector<8x128xf32>
    %347 = math.tanh %346 : vector<8x128xf32>
    %cst_127 = arith.constant 5.000000e-01 : f32
    %348 = vector.broadcast %cst_127 : f32 to vector<8x128xf32>
    %349 = arith.mulf %348, %347 : vector<8x128xf32>
    %cst_128 = arith.constant 5.000000e-01 : f32
    %350 = vector.broadcast %cst_128 : f32 to vector<8x128xf32>
    %351 = arith.addf %349, %350 : vector<8x128xf32>
    %352 = arith.mulf %351, %306 : vector<8x128xf32>
    %cst_129 = arith.constant 1.000000e+00 : f32
    %353 = vector.broadcast %cst_129 : f32 to vector<8x128xf32>
    %354 = arith.subf %353, %351 : vector<8x128xf32>
    %355 = arith.mulf %354, %335 : vector<8x128xf32>
    %356 = arith.addf %352, %355 : vector<8x128xf32>
    %357 = arith.mulf %19, %306 : vector<8x128xf32>
    %358 = arith.addf %337, %357 : vector<8x128xf32>
    %359 = arith.addf %358, %25 : vector<8x128xf32>
    %cst_130 = arith.constant 5.000000e-01 : f32
    %360 = vector.broadcast %cst_130 : f32 to vector<8x128xf32>
    %361 = arith.mulf %360, %359 : vector<8x128xf32>
    %362 = math.tanh %361 : vector<8x128xf32>
    %cst_131 = arith.constant 5.000000e-01 : f32
    %363 = vector.broadcast %cst_131 : f32 to vector<8x128xf32>
    %364 = arith.mulf %363, %362 : vector<8x128xf32>
    %cst_132 = arith.constant 5.000000e-01 : f32
    %365 = vector.broadcast %cst_132 : f32 to vector<8x128xf32>
    %366 = arith.addf %364, %365 : vector<8x128xf32>
    %367 = arith.mulf %366, %356 : vector<8x128xf32>
    %cst_133 = arith.constant 1.000000e+00 : f32
    %368 = vector.broadcast %cst_133 : f32 to vector<8x128xf32>
    %369 = arith.subf %368, %366 : vector<8x128xf32>
    %370 = arith.mulf %369, %341 : vector<8x128xf32>
    %371 = arith.addf %367, %370 : vector<8x128xf32>
    %372 = arith.truncf %371 : vector<8x128xf32> to vector<8x128xbf16>
    %373 = arith.index_cast %331 : i32 to index
    %c0_134 = arith.constant 0 : index
    %c0_135 = arith.constant 0 : index
    %374 = vector.load %arg7[%373, %c0_134, %c0_135] : memref<8x8x128xbf16, #tpu.memory_space<vmem>>, vector<1x8x128xbf16>
    %375 = vector.shape_cast %374 : vector<1x8x128xbf16> to vector<8x128xbf16>
    %376 = vector.shape_cast %372 : vector<8x128xbf16> to vector<1x8x128xbf16>
    tpu.vector_store %arg7[%373, %c0_134, %c0_135], %376 {strides = array<i32>} : memref<8x8x128xbf16, #tpu.memory_space<vmem>>, vector<1x8x128xbf16>,
    %c7_i32_136 = arith.constant 7 : i32
    %c7_i32_137 = arith.constant 7 : i32
    %377 = arith.muli %arg0, %c7_i32_137 : i32
    %c2_i32_138 = arith.constant 2 : i32
    %378 = arith.muli %c2_i32_138, %arg0 : i32
    %c1_i32_139 = arith.constant 1 : i32
    %379 = arith.subi %c1_i32_139, %378 : i32
    %380 = arith.muli %379, %c7_i32_136 : i32
    %381 = arith.addi %377, %380 : i32
    %382 = arith.index_cast %381 : i32 to index
    %c0_140 = arith.constant 0 : index
    %c0_141 = arith.constant 0 : index
    %383 = vector.load %arg9[%382, %c0_140, %c0_141] : memref<8x8x384xf32, #tpu.memory_space<vmem>>, vector<1x8x384xf32>
    %384 = vector.shape_cast %383 : vector<1x8x384xf32> to vector<8x384xf32>
    %385 = vector.extract_strided_slice %384 {offsets = [0, 0], sizes = [8, 128], strides = [1, 1]} : vector<8x384xf32> to vector<8x128xf32>
    %386 = vector.extract_strided_slice %384 {offsets = [0, 128], sizes = [8, 128], strides = [1, 1]} : vector<8x384xf32> to vector<8x128xf32>
    %387 = vector.extract_strided_slice %384 {offsets = [0, 256], sizes = [8, 128], strides = [1, 1]} : vector<8x384xf32> to vector<8x128xf32>
    %388 = arith.index_cast %381 : i32 to index
    %c0_142 = arith.constant 0 : index
    %c0_143 = arith.constant 0 : index
    %389 = vector.load %arg2[%388, %c0_142, %c0_143] : memref<8x8x128xbf16, #tpu.memory_space<vmem>>, vector<1x8x128xbf16>
    %390 = vector.shape_cast %389 : vector<1x8x128xbf16> to vector<8x128xbf16>
    %391 = arith.extf %390 : vector<8x128xbf16> to vector<8x128xf32>
    %392 = arith.mulf %16, %356 : vector<8x128xf32>
    %393 = arith.addf %386, %392 : vector<8x128xf32>
    %394 = arith.addf %393, %22 : vector<8x128xf32>
    %cst_144 = arith.constant 5.000000e-01 : f32
    %395 = vector.broadcast %cst_144 : f32 to vector<8x128xf32>
    %396 = arith.mulf %395, %394 : vector<8x128xf32>
    %397 = math.tanh %396 : vector<8x128xf32>
    %cst_145 = arith.constant 5.000000e-01 : f32
    %398 = vector.broadcast %cst_145 : f32 to vector<8x128xf32>
    %399 = arith.mulf %398, %397 : vector<8x128xf32>
    %cst_146 = arith.constant 5.000000e-01 : f32
    %400 = vector.broadcast %cst_146 : f32 to vector<8x128xf32>
    %401 = arith.addf %399, %400 : vector<8x128xf32>
    %402 = arith.mulf %401, %356 : vector<8x128xf32>
    %cst_147 = arith.constant 1.000000e+00 : f32
    %403 = vector.broadcast %cst_147 : f32 to vector<8x128xf32>
    %404 = arith.subf %403, %401 : vector<8x128xf32>
    %405 = arith.mulf %404, %385 : vector<8x128xf32>
    %406 = arith.addf %402, %405 : vector<8x128xf32>
    %407 = arith.mulf %19, %356 : vector<8x128xf32>
    %408 = arith.addf %387, %407 : vector<8x128xf32>
    %409 = arith.addf %408, %25 : vector<8x128xf32>
    %cst_148 = arith.constant 5.000000e-01 : f32
    %410 = vector.broadcast %cst_148 : f32 to vector<8x128xf32>
    %411 = arith.mulf %410, %409 : vector<8x128xf32>
    %412 = math.tanh %411 : vector<8x128xf32>
    %cst_149 = arith.constant 5.000000e-01 : f32
    %413 = vector.broadcast %cst_149 : f32 to vector<8x128xf32>
    %414 = arith.mulf %413, %412 : vector<8x128xf32>
    %cst_150 = arith.constant 5.000000e-01 : f32
    %415 = vector.broadcast %cst_150 : f32 to vector<8x128xf32>
    %416 = arith.addf %414, %415 : vector<8x128xf32>
    %417 = arith.mulf %416, %406 : vector<8x128xf32>
    %cst_151 = arith.constant 1.000000e+00 : f32
    %418 = vector.broadcast %cst_151 : f32 to vector<8x128xf32>
    %419 = arith.subf %418, %416 : vector<8x128xf32>
    %420 = arith.mulf %419, %391 : vector<8x128xf32>
    %421 = arith.addf %417, %420 : vector<8x128xf32>
    %422 = arith.truncf %421 : vector<8x128xf32> to vector<8x128xbf16>
    %423 = arith.index_cast %381 : i32 to index
    %c0_152 = arith.constant 0 : index
    %c0_153 = arith.constant 0 : index
    %424 = vector.load %arg7[%423, %c0_152, %c0_153] : memref<8x8x128xbf16, #tpu.memory_space<vmem>>, vector<1x8x128xbf16>
    %425 = vector.shape_cast %424 : vector<1x8x128xbf16> to vector<8x128xbf16>
    %426 = vector.shape_cast %422 : vector<8x128xbf16> to vector<1x8x128xbf16>
    tpu.vector_store %arg7[%423, %c0_152, %c0_153], %426 {strides = array<i32>} : memref<8x8x128xbf16, #tpu.memory_space<vmem>>, vector<1x8x128xbf16>,
    %c8_i32 = arith.constant 8 : i32
    %c0_154 = arith.constant 0 : index
    %c0_155 = arith.constant 0 : index
    %427 = vector.load %arg10[%c0_154, %c0_155] : memref<8x128xf32, #tpu.memory_space<vmem>>, vector<8x128xf32>
    tpu.vector_store %arg10[%c0_154, %c0_155], %406 {strides = array<i32>} : memref<8x128xf32, #tpu.memory_space<vmem>>, vector<8x128xf32>,
    return
  }
  func.func @transform_0(%arg0: i32, %arg1: i32) -> (i32, i32, i32) {
    %c0_i32 = arith.constant 0 : i32
    %0 = arith.muli %arg0, %c0_i32 : i32
    %c2_i32 = arith.constant 2 : i32
    %1 = arith.muli %c2_i32, %arg0 : i32
    %c1_i32 = arith.constant 1 : i32
    %2 = arith.subi %c1_i32, %1 : i32
    %3 = arith.muli %2, %arg1 : i32
    %4 = arith.addi %0, %3 : i32
    %c0_i32_0 = arith.constant 0 : i32
    %c0_i32_1 = arith.constant 0 : i32
    %c0_i32_2 = arith.constant 0 : i32
    return %4, %c0_i32_0, %c0_i32_1 : i32, i32, i32
  }
  func.func @transform_1(%arg0: i32, %arg1: i32) -> (i32, i32, i32) {
    %c0_i32 = arith.constant 0 : i32
    %c0_i32_0 = arith.constant 0 : i32
    %c0_i32_1 = arith.constant 0 : i32
    return %arg0, %c0_i32, %c0_i32_0 : i32, i32, i32
  }
  func.func @transform_2(%arg0: i32, %arg1: i32) -> (i32, i32, i32) {
    %c0_i32 = arith.constant 0 : i32
    %c0_i32_0 = arith.constant 0 : i32
    %c0_i32_1 = arith.constant 0 : i32
    return %arg0, %c0_i32, %c0_i32_0 : i32, i32, i32
  }
  func.func @transform_3(%arg0: i32, %arg1: i32) -> (i32, i32, i32) {
    %c0_i32 = arith.constant 0 : i32
    %c0_i32_0 = arith.constant 0 : i32
    %c0_i32_1 = arith.constant 0 : i32
    return %arg0, %c0_i32, %c0_i32_0 : i32, i32, i32
  }
  func.func @transform_4(%arg0: i32, %arg1: i32) -> (i32, i32, i32) {
    %c0_i32 = arith.constant 0 : i32
    %c0_i32_0 = arith.constant 0 : i32
    %c0_i32_1 = arith.constant 0 : i32
    return %arg0, %c0_i32, %c0_i32_0 : i32, i32, i32
  }
  func.func @transform_5(%arg0: i32, %arg1: i32) -> (i32, i32, i32) {
    %c0_i32 = arith.constant 0 : i32
    %0 = arith.muli %arg0, %c0_i32 : i32
    %c2_i32 = arith.constant 2 : i32
    %1 = arith.muli %c2_i32, %arg0 : i32
    %c1_i32 = arith.constant 1 : i32
    %2 = arith.subi %c1_i32, %1 : i32
    %3 = arith.muli %2, %arg1 : i32
    %4 = arith.addi %0, %3 : i32
    %c0_i32_0 = arith.constant 0 : i32
    %c0_i32_1 = arith.constant 0 : i32
    return %4, %c0_i32_0, %arg0 : i32, i32, i32
  }
  func.func @transform_6(%arg0: i32, %arg1: i32) -> (i32, i32) {
    %c0_i32 = arith.constant 0 : i32
    %c0_i32_0 = arith.constant 0 : i32
    return %c0_i32, %arg0 : i32, i32
  }
}

</mosaic_0001>

<bundles_post_ra>
// kernel: tpu_custom_call.1
= control target key start
LH: loop header
LB: loop body
LE: loop exit
PB: predicated region body
PF: predicated region fallthrough
CT: control target
= control target key end

     0   :  { %s2442_s0 = inlined_call_operand.hbm [shape: bf16[8,8,128], index: 0, kind: input, shape index: {}]   ;;  %s2443_s1 = inlined_call_operand.hbm [shape: bf16[2,128,384], index: 1, kind: input, shape index: {}]   ;;  %s2444_s2 = inlined_call_operand.vmem [shape: f32[2,2,128], index: 2, kind: input, shape index: {}]   ;;  %s2445_s3 = inlined_call_operand.vmem [shape: f32[2,2,128], index: 3, kind: input, shape index: {}]   ;;  %s2446_s4 = inlined_call_operand.hbm [shape: f32[2,8,128], index: 4, kind: input, shape index: {}]   ;;  %s2447_s5 = inlined_call_operand.hbm [shape: bf16[8,8,256], index: 5, kind: output, shape index: {0}]   ;;  %s2448_s6 = inlined_call_operand.hbm [shape: f32[8,256], index: 6, kind: output, shape index: {1}]  }
   0x1   :  { %2463 = sst [smem:[#allocation21_spill]] %s2443_s1 }
   0x2   :  { %12 = vsyncpa [#allocation5], 0 }
   0x3   :  { %14 = vsyncpa [#allocation5 + $0x1], 0 }
   0x4   :  { %15 = vsyncpa [#allocation8], 0 }
   0x5   :  { %17 = vsyncpa [#allocation8 + $0x1], 0 }
   0x6   :  { %18 = vsyncpa [#allocation6], 0 }
   0x7   :  { %20 = vsyncpa [#allocation6 + $0x1], 0 }
   0x8   :  { %21 = vsyncpa [#allocation12], 0 }
   0x9   :  { %23 = vsyncpa [#allocation12 + $0x1], 0  ;;  %s1987_s21 = smov 0   ;;  %s1989_s22 = smov 0  }
   0xa   :  { %s1991_s23 = smov 0   ;;  %s1993_s24 = smov 0  }
   0xb   :  { %s1995_s25 = smov 0   ;;  %s1997_s26 = smov 0  }
   0xc LB: > { %2464 = sst [smem:[#allocation17_spill]] %s1924_s23  ;;  %s2018_s27 = sadd.s32 4294967295, %s1936_s26   ;;  %s1936_s26 = sphi %s1997_s26, %s29_s26   ;;  %s1932_s25 = sphi %s1995_s25, %s2498_s25   ;;  %s1928_s24 = sphi %s1993_s24, %s2497_s24   ;;  %s1924_s23 = sphi %s1991_s23, %s2493_s23   ;;  %s1920_s22 = sphi %s1989_s22, %s2496_s22   ;;  %s1916_s21 = sphi %s1987_s21, %s2495_s21  }
   0xd   : > { %2465 = sst [smem:[#allocation18_spill]] %s1936_s26  ;;  %s1440_s28 = sadd.s32 4294967294, %s1936_s26  }
   0xe   : > { %s41_s29 = sadd.s32 1, %s1932_s25  ;;  %s80_s30 = sadd.s32 1, %s1924_s23 }
   0xf   : > { %p43_p0 = scmp.ge.s32.totalorder %s41_s29, 2  ;;  %p87_p1 = scmp.ne.s32.totalorder %s1924_s23, %s1920_s22 }
  0x10   : > { %p2452_p2 = scmp.eq.s32.totalorder %s1936_s26, 0  ;;  %p93_p3 = scmp.ne.s32.totalorder %s1920_s22, %s1916_s21 }
  0x11   : > { %s2500_s29 = smov (%p43_p0, %s41_s29), 0  ;;  %p2450_p5 = scmp.eq.s32.totalorder %s2018_s27, 0 }
  0x12   : > { %2466 = sst [smem:[#allocation19_spill]] %s2500_s29  ;;  %p2032_p4 = por %p2452_p2, %p87_p1 }
  0x13   : > { %s77_s8 = ssub.s32 %s1932_s25, %s2500_s29  ;;  %p203_p6 = scmp.eq.s32.totalorder %s2018_s27, 1 }
  0x14   : > { %p78_p7 = scmp.eq.s32.totalorder %s77_s8, 0  ;;  %p2042_p8 = por %p2450_p5, %p93_p3 }
  0x15   : > { %p2046_p9 = por %p203_p6, %p87_p1  ;;  %p209_p10 = scmp.eq.s32.totalorder %s1440_s28, 1 }
  0x16   : > { %s2468_s9 = scalar_select %p2042_p8, 1, 0 }
  0x17   : > { %s2469_s10 = scalar_select %p2046_p9, 1, 0 }
  0x18   : > { %s2051_s11 = scalar_select %p78_p7, %s1924_s23, %s80_s30  }
  0x19   : > { %p2053_p11 = por %p209_p10, %p93_p3  ;;  %p2451_p13 = scmp.lt.s32.totalorder %s1936_s26, 2 }
  0x1a   : > { %2470 = sst [smem:[#allocation20_spill]] %s2051_s11  ;;  %s279_s13 = sand.u32 1, %s1936_s26  }
  0x1b   : > { %s2471_s12 = scalar_select %p2053_p11, 1, 0 }
  0x1c   : > { %s2449_s14 = sand.u32 1, %s1924_s23   ;;  %s1569_s16 = smul.u32 3072, %s1932_s25 }
  0x1d   : > { %s1568_s15 = smul.u32 192, %s2449_s14  ;;  %p2068_p0 = pnand %p2451_p13, %p2032_p4 }
  0x1e   : > { %s2473_s1 = sld [smem:[#allocation21_spill]]  ;;  %s2080_s7 = scalar_lea.sflag [#allocation8], %s279_s13 }
  0x1f   : > { %s2472_s17 = scalar_select %p2068_p0, 1, 0 }
  0x20   : > { %s283_s28 = scalar_lea.vmem [#allocation7], %s1568_s15  ;;  %p2455_p4 = pneg %p2068_p0 }
  0x21   : > { %s290_s30 = sshll.u32 %s283_s28, 4  ;;  %s2077_s30 = int_to_ptr.vmem [resolvable:$true] %s290_s30 }
  0x24   : > { %s2075_s20 = scalar_lea.hbm %s2473_s1, %s1569_s16  ;;  %s1735_s19 = scalar_lea.hbm %s2473_s1, 6144 }
  0x25   : > { %s1730_s8 = scalar_lea.hbm %s2075_s20, 3072  ;;  %p1736_p10 = scmp.lt.u32.totalorder %s2075_s20, %s2473_s1 }
  0x26   : > { %p1731_p3 = scmp.ne.s32.totalorder %s2075_s20, %s1730_s8  ;;  %p1737_p12 = scmp.lt.u32.totalorder %s1735_s19, %s1730_s8 }
  0x27   : > { %p1739_p13 = scmp.lt.u32.totalorder %s1730_s8, %s2075_s20 }
  0x28   : > { %p1733_p6 = pnand %p2455_p4, %p1731_p3  ;;  %p1738_p5 = por %p1737_p12, %p1736_p10 }
  0x2a   : > { %p1734_p7 = pneg %p1733_p6  ;;  %p1740_p2 = por %p1739_p13, %p1738_p5 }
  0x2c   : > { %p1741_p1 = pnand %p1740_p2, %p1734_p7 }
  0x2e   : > { %1744 = shalt.err (!%p1741_p1)
}
  0x2f   : > { %s1745_s13 = scalar_lea.vmem %s2077_s30, 3072  ;;  %s1938_s28 = smov [#allocation7]  }
  0x30   : > { %p1746_p3 = scmp.ne.s32.totalorder %s2077_s30, %s1745_s13  ;;  %s1750_s16 = sshll.u32 %s1938_s28, 4  ;;  %s1751_s16 = int_to_ptr.vmem [resolvable:$false] %s1750_s16 }
  0x31   : > { %s1752_s14 = scalar_lea.vmem %s1751_s16, 6144  ;;  %p1753_p9 = scmp.lt.s32.totalorder %s2077_s30, %s1751_s16 }
  0x32   : > { %p1748_p6 = pnand %p1746_p3, %p2455_p4  ;;  %p1754_p12 = scmp.lt.s32.totalorder %s1752_s14, %s1745_s13 }
  0x34   : > { %p1749_p11 = pneg %p1748_p6  ;;  %p1755_p10 = por %p1754_p12, %p1753_p9 }
  0x36   : > { %p1756_p5 = pnand %p1755_p10, %p1749_p11 }
  0x38   : > { %1759 = shalt.err (!%p1756_p5)
}
  0x39   : > { %s1939_s8 = smov 192   ;;  %s1940_s18 = smov 12  }
  0x3a   : > { %1589 = dma.hbm_to_vmem [thread:$0]  (!%p2068_p0), %s2075_s20, 3072, %s2077_s30, %s2080_s7, %s1939_s8, %s1939_s8, %s1940_s18  }
  0x3b   : > { %p330_p2 = scmp.lt.s32.totalorder %s1936_s26, 3  ;;  %p2474_p13 = scmp.ge.s32.totalorder %s1936_s26, 1 }
  0x3c   : > { %s1941_s15 = smov [#allocation4]   ;;  %p2476_p9 = scmp.eq.s32.totalorder %s1936_s26, 0 }
  0x3d   : > { %p2111_p1 = pnand %p2474_p13, %p330_p2  ;;  %s269_s13 = sshll.u32 %s1941_s15, 4  ;;  %s270_s13 = int_to_ptr.vmem [resolvable:$true] %s269_s13 }
  0x3e   : > { %p2477_p11 = scmp.lt.s32.totalorder %s1936_s26, 2  ;;  %s2479_s16 = sand.u32 1, %s1924_s23  }
  0x3f   : > { %s2475_s19 = scalar_select %p2111_p1, 1, 0 }
  0x40   : > { %p2119_p7 = pnand %p2477_p11, %p2476_p9  ;;  %s1450_s14 = sshll.u32 %s2479_s16, 3 }
  0x41   : > { %s1760_s30 = scalar_lea.hbm %s2442_s0, 512 }
  0x42   : > { %p1761_p3 = scmp.ne.s32.totalorder %s2442_s0, %s1760_s30  ;;  %p1762_p6 = pneg %p2119_p7 }
  0x43   : > { %p1767_p5 = scmp.lt.u32.totalorder %s1760_s30, %s2442_s0 }
  0x44   : > { %p1763_p12 = pnand %p1762_p6, %p1761_p3 }
  0x46   : > { %p1764_p10 = pneg %p1763_p12 }
  0x48   : > { %p1769_p2 = pnand %p1767_p5, %p1764_p10 }
  0x4a   : > { %1772 = shalt.err (!%p1769_p2)
}
  0x4b   : > { %s1773_s11 = scalar_lea.vmem %s270_s13, 512  ;;  %s1780_s1 = scalar_lea.vmem %s270_s13, 1024 }
  0x4c   : > { %p1774_p13 = scmp.ne.s32.totalorder %s270_s13, %s1773_s11  ;;  %p1781_p4 = scmp.lt.s32.totalorder %s270_s13, %s270_s13 }
  0x4d   : > { %p1782_p8 = scmp.lt.s32.totalorder %s1780_s1, %s1773_s11 }
  0x4e   : > { %p1776_p9 = pnand %p1774_p13, %p1762_p6 }
  0x4f   : > { %p1783_p1 = por %p1782_p8, %p1781_p4 }
  0x50   : > { %p1777_p11 = pneg %p1776_p9 }
  0x52   : > { %p1784_p0 = pnand %p1783_p1, %p1777_p11 }
  0x54   : > { %1787 = shalt.err (!%p1784_p0)
}
  0x55   : > { %s1942_s16 = smov 64   ;;  %s1943_s20 = smov 4  }
  0x56   : > { %1586 = dma.hbm_to_vmem [thread:$0]  (!%p2119_p7), %s2442_s0, 512, %s270_s13, [#allocation5], %s1942_s16, %s1942_s16, %s1943_s20  }
  0x57   : > { %s1451_s8 = sshll.u32 %s1932_s25, 7  ;;  %s318_s11 = scalar_lea.vmem [#allocation9], %s1450_s14 }
  0x58   : > { %s2145_s23 = scalar_lea.hbm %s2446_s4, %s1451_s8  ;;  %s325_s1 = sshll.u32 %s318_s11, 4  ;;  %s326_s1 = int_to_ptr.vmem [resolvable:$true] %s325_s1 }
  0x59   : > { %s1788_s26 = scalar_lea.hbm %s2145_s23, 128  ;;  %p2480_p0 = scmp.ne.s32.totalorder %s2472_s17, 0 }
  0x5a   : > { %p1789_p8 = scmp.ne.s32.totalorder %s2145_s23, %s1788_s26  ;;  %s1793_s16 = scalar_lea.hbm %s2446_s4, 256 }
  0x5b   : > { %p2481_p4 = pneg %p2480_p0  ;;  %p1794_p7 = scmp.lt.u32.totalorder %s2145_s23, %s2446_s4 }
  0x5c   : > { %p1795_p6 = scmp.lt.u32.totalorder %s1793_s16, %s1788_s26  ;;  %p1797_p10 = scmp.lt.u32.totalorder %s1788_s26, %s2145_s23 }
  0x5d   : > { %p1791_p1 = pnand %p1789_p8, %p2481_p4 }
  0x5e   : > { %p1796_p12 = por %p1795_p6, %p1794_p7 }
  0x5f   : > { %p1792_p3 = pneg %p1791_p1 }
  0x60   : > { %p1798_p5 = por %p1797_p10, %p1796_p12 }
  0x62   : > { %p1799_p2 = pnand %p1798_p5, %p1792_p3 }
  0x64   : > { %1802 = shalt.err (!%p1799_p2)
}
  0x65   : > { %s1803_s14 = scalar_lea.vmem %s326_s1, 128  ;;  %p2482_p9 = pmov %p2481_p4 }
  0x66   : > { %p1804_p13 = scmp.ne.s32.totalorder %s326_s1, %s1803_s14  ;;  %s1944_s30 = smov [#allocation9]  }
  0x67   : > { %s1808_s8 = sshll.u32 %s1944_s30, 4  ;;  %s1809_s8 = int_to_ptr.vmem [resolvable:$false] %s1808_s8 }
  0x68   : > { %p1806_p11 = pnand %p1804_p13, %p2482_p9  ;;  %s1810_s18 = scalar_lea.vmem %s1809_s8, 256 }
  0x69   : > { %p1811_p4 = scmp.lt.s32.totalorder %s326_s1, %s1809_s8  ;;  %p1812_p1 = scmp.lt.s32.totalorder %s1810_s18, %s1803_s14 }
  0x6a   : > { %p1807_p8 = pneg %p1806_p11 }
  0x6b   : > { %p1813_p6 = por %p1812_p1, %p1811_p4 }
  0x6d   : > { %p1814_p7 = pnand %p1813_p6, %p1807_p8 }
  0x6f   : > { %1817 = shalt.err (!%p1814_p7)
}
  0x70   : > { %1592 = dma.hbm_to_vmem [thread:$0]  (!%p2480_p0), %s2145_s23, 128, %s326_s1, %s2080_s7  }
  0x71   : > { %p2483_p3 = scmp.ne.s32.totalorder %s2475_s19, 0 }
  0x72   : > { %p2484_p12 = scmp.eq.s32.totalorder (!%p2483_p3), %s2018_s27, 0 }
  0x73   : > { %334 = sbr.rel (%p2483_p3) target bundleno = 671 (0x29f), region = 40 }
  0x7a   : > { %1899 = dma.done.wait (%p2484_p12), [#allocation5], 512   ;;  %p2485_p10 = pmov %p2484_p12 }
  0x7b   : > { %s345_s26 = sand.u32 1, %s2018_s27   ;;  %s2175_s15 = sand.u32 1, %s1920_s22  }
  0x7c   : > { %1901 = vsyncadd (%p2485_p10), [#allocation5], 4294966784  ;;  %s1570_s17 = smul.u32 192, %s2175_s15  ;;  %s346_s11 = scalar_lea.sflag [#allocation8], %s345_s26 }
  0x7d   : > { %p2486_p0 = scmp.ne.s32.totalorder %s2468_s9, 0 }
  0x7e   : > { %s2178_s13 = scalar_lea.vmem [#allocation7], %s1570_s17 }
  0x7f   : > { %1903 = dma.done.wait (%p2486_p0), %s346_s11, 3200  }
  0x80   : > { %1905 = vsyncadd (%p2486_p0), %s346_s11, 4294964096  ;;  %v1945_v0 = vmov 0   ;;  %v1662_v1 = vld [vmem:[%s2178_s13 + $0x4] ss:$12 sps:$4 sm:$0xff]   ;;  %v1664_v2 = vld [vmem:[%s2178_s13] ss:$12 sps:$4 sm:$0xff]   ;;  %v790_v45 = vlaneseq }
  0x81   : > { %652 = vmatprep.mubr.bf16.mxu0 %v1945_v0  ;;  %620 = vmatprep.subr.bf16.mxu0 %v1662_v1  ;;  %v1665_v3 = vld [vmem:[%s2178_s13 + $0x1c] ss:$12 sps:$4 sm:$0xff]   ;;  %v1667_v4 = vld [vmem:[%s2178_s13 + $0x18] ss:$12 sps:$4 sm:$0xff]   ;;  %v1668_v5 = vld [vmem:[%s2178_s13 + $0x34] ss:$12 sps:$4 sm:$0xff]  }
  0x82   : > { %621 = vmatpush1.bf16.msra.mxu0 %v1664_v2  ;;  %v1674_v6 = vld [vmem:[%s2178_s13 + $0x8] ss:$12 sps:$4 sm:$0xff]   ;;  %v1670_v7 = vld [vmem:[%s2178_s13 + $0x30] ss:$12 sps:$4 sm:$0xff]   ;;  %v1671_v8 = vld [vmem:[%s2178_s13 + $0x4c] ss:$12 sps:$4 sm:$0xff]  }
  0x83   : > { %622 = vmatprep.subr.bf16.mxu0 %v1665_v3  ;;  %1544 = vmatprep.subr.bf16.mxu1 %v1674_v6  ;;  %v1678_v9 = vld [vmem:[%s2178_s13 + $0x20] ss:$12 sps:$4 sm:$0xff]   ;;  %v1682_v10 = vld [vmem:[%s2178_s13 + $0x38] ss:$12 sps:$4 sm:$0xff]   ;;  %v1673_v11 = vld [vmem:[%s2178_s13 + $0x48] ss:$12 sps:$4 sm:$0xff]  }
  0x84   : > { %1545 = vmatpush3.bf16.msra.mxu1 %v1674_v6  ;;  %v1675_v12 = vld [vmem:[%s2178_s13 + $0x64] ss:$12 sps:$4 sm:$0xff]   ;;  %v1677_v13 = vld [vmem:[%s2178_s13 + $0x60] ss:$12 sps:$4 sm:$0xff]   ;;  %v1679_v15 = vld [vmem:[%s2178_s13 + $0x7c] ss:$12 sps:$4 sm:$0xff]  }
  0x85   : > { %1546 = vmatprep.subr.bf16.mxu1 %v1678_v9  ;;  %v1686_v14 = vld [vmem:[%s2178_s13 + $0x50] ss:$12 sps:$4 sm:$0xff]   ;;  %v1691_v16 = vld [vmem:[#allocation4] sm:$0xff]   ;;  %v1690_v17 = vld [vmem:[%s2178_s13 + $0x68] ss:$12 sps:$4 sm:$0xff]   ;;  %s1491_s23 = sshll.u32 %s1928_s24, 1 }
  0x86   : > { %623 = vmatpush1.bf16.msra.mxu0 %v1667_v4  ;;  %1560 = vmatprep.mubr.bf16.mxu1 %v1691_v16  ;;  %v1681_v18 = vld [vmem:[%s2178_s13 + $0x78] ss:$12 sps:$4 sm:$0xff]   ;;  %v1683_v19 = vld [vmem:[%s2178_s13 + $0x94] ss:$12 sps:$4 sm:$0xff]   ;;  %v1685_v21 = vld [vmem:[%s2178_s13 + $0x90] ss:$12 sps:$4 sm:$0xff]  }
  0x87   : > { %624 = vmatprep.subr.bf16.mxu0 %v1668_v5  ;;  %v1692_v20 = vld [vmem:[%s2178_s13 + $0x80] ss:$12 sps:$4 sm:$0xff]   ;;  %v1693_v23 = vld [vmem:[%s2178_s13 + $0x98] ss:$12 sps:$4 sm:$0xff]   ;;  %v1689_v24 = vld [vmem:[%s2178_s13 + $0xa8] ss:$12 sps:$4 sm:$0xff]  }
  0x88   : > { %1547 = vmatpush3.bf16.msra.mxu1 %v1678_v9  ;;  %v1687_v22 = vld [vmem:[%s2178_s13 + $0xac] ss:$12 sps:$4 sm:$0xff]   ;;  %v1695_v25 = vld [vmem:[%s2178_s13 + $0xb0] ss:$12 sps:$4 sm:$0xff]   ;;  %s2213_s27 = ssub.s32 1, %s1491_s23  ;;  %s2216_s9 = smul.u32 7, %s1928_s24 }
  0x89   : > { %1548 = vmatprep.subr.bf16.mxu1 %v1682_v10  ;;  %v1694_v26 = vld [vmem:[#allocation4 + $0x8] sm:$0xff]   ;;  %v1696_v27 = vld [vmem:[#allocation4 + $0x10] sm:$0xff]   ;;  %v1697_v28 = vld [vmem:[#allocation4 + $0x18] sm:$0xff]   ;;  %s1502_s7 = sshll.u32 %s2213_s27, 2  ;;  %s997_s1 = smul.u32 5, %s2213_s27  ;;  %v791_v50 = vshrl.u32 %v790_v45, 7 }
  0x8a   : > { %625 = vmatpush1.bf16.msra.mxu0 %v1670_v7  ;;  %s2220_s19 = sadd.s32 %s1502_s7, %s2216_s9  ;;  %s1035_s28 = smul.u32 6, %s2213_s27 }
  0x8b   : > { %626 = vmatprep.subr.bf16.mxu0 %v1671_v8  ;;  %s2225_s16 = sadd.s32 %s997_s1, %s2216_s9  ;;  %s1073_s20 = smul.u32 7, %s2213_s27  ;;  %v792_v52 = vsub.s32 0, %v791_v50  ;;  %v796_v53 = vsub.s32 1, %v791_v50 }
  0x8c   : > { %1549 = vmatpush3.bf16.msra.mxu1 %v1682_v10  ;;  %s2229_s29 = sadd.s32 %s1035_s28, %s2216_s9  ;;  %p414_p5 = scmp.lt.s32.totalorder %s1928_s24, 1 }
  0x8d   : > { %1550 = vmatprep.subr.bf16.mxu1 %v1686_v14  ;;  %s2232_s14 = sadd.s32 %s1073_s20, %s2216_s9  ;;  %s1454_s11 = sshll.u32 %s2175_s15, 3 }
  0x8e   : > { %627 = vmatpush1.bf16.msra.mxu0 %v1673_v11  ;;  %s2236_s30 = scalar_select %p414_p5, %s1928_s24, 1 }
  0x8f   : > { %628 = vmatprep.subr.bf16.mxu0 %v1675_v12  ;;  %s1522_s1 = smul.u32 168, %s1928_s24  ;;  %s358_s28 = scalar_lea.vmem [#allocation9], %s1454_s11 }
  0x90   : > { %1551 = vmatpush3.bf16.msra.mxu1 %v1686_v14  ;;  %s1457_s8 = sshll.u32 %s2236_s30, 1  ;;  %v785_v60 = vld [vmem:[%s358_s28] sm:$0xff]  ;;  %s1523_s30 = smul.u32 28, %s1928_s24 }
  0x91   : > { %1552 = vmatprep.subr.bf16.mxu1 %v1690_v17  ;;  %s417_s17 = scalar_lea.vmem %s2444_s2, %s1457_s8  ;;  %s421_s7 = scalar_lea.vmem %s2445_s3, %s1457_s8 }
  0x92   : > { %629 = vmatpush1.bf16.msra.mxu0 %v1677_v13  ;;  %v788_v55 = vld [vmem:[%s417_s17] sm:$0x3]  ;;  %s810_s20 = scalar_lea.vmem [#allocation2], %s1522_s1  ;;  %s2264_s8 = sadd.s32 %s2213_s27, %s2216_s9 }
  0x93   : > { %630 = vmatprep.subr.bf16.mxu0 %v1679_v15  ;;  %v2246_v58 = vrot.slane %v788_v55, %v792_v52  ;;  %v2248_v59 = vrot.slane %v788_v55, %v796_v53  ;;  %v789_v61 = vld [vmem:[%s421_s7] sm:$0x3]  ;;  %s815_s18 = scalar_lea.vmem [#allocation4], %s1523_s30  ;;  %s1525_s26 = smul.u32 24, %s2264_s8 }
  0x94   : > { %1553 = vmatpush3.bf16.msra.mxu1 %v1690_v17  ;;  %v2257_v1 = vrot.slane %v789_v61, %v796_v53  ;;  %v816_v15 = vld [vmem:[%s815_s18] sm:$0xf]  ;;  %s1455_s17 = sshll.u32 %s2175_s15, 5  ;;  %s1493_s1 = sshll.u32 %s2264_s8, 2 }
  0x95   : > { %1554 = vmatprep.subr.bf16.mxu1 %v1692_v20  ;;  %v818_v62 = vmul.f32 %v2246_v58, %v785_v60  ;;  %v829_v63 = vmul.f32 %v2248_v59, %v785_v60  ;;  %s849_s13 = scalar_lea.vmem [#allocation2], %s1525_s26  ;;  %s2272_s23 = scalar_lea.vmem [#allocation10], %s1455_s17 }
  0x96   : > { %631 = vmatpush1.bf16.msra.mxu0 %v1681_v18  ;;  %s842_s7 = scalar_lea.vmem %s2272_s23, %s1523_s30 [#allocation10]  ;;  %s1495_s28 = sshll.u32 %s2213_s27, 1 }
  0x97   : > { %632 = vmatprep.subr.bf16.mxu0 %v1683_v19  ;;  %v817_v19 = vunpack.c.l.bf16 %v816_v15  ;;  %s854_s30 = scalar_lea.vmem [#allocation4], %s1493_s1  ;;  %s881_s17 = scalar_lea.vmem %s2272_s23, %s1493_s1 [#allocation10] }
  0x98   : > { %1555 = vmatpush3.bf16.msra.mxu1 %v1692_v20  ;;  %p2487_p13 = scmp.ne.s32.totalorder %s2469_s10, 0 }
  0x99   : > { %1556 = vmatprep.subr.bf16.mxu1 %v1693_v23 }
  0x9a   : > { %633 = vmatpush1.bf16.msra.mxu0 %v1685_v21 }
  0x9b   : > { %634 = vmatprep.subr.bf16.mxu0 %v1687_v22 }
  0x9c   : > { %1557 = vmatpush3.bf16.msra.mxu1 %v1693_v23 }
  0x9d   : > { %1558 = vmatprep.subr.bf16.mxu1 %v1695_v25 }
  0x9e   : > { %635 = vmatpush1.bf16.msra.mxu0 %v1689_v24 }
  0xa0   : > { %1559 = vmatpush3.bf16.msra.mxu1 %v1695_v25 }
  0xa1   : > { %653 = vmatmul.mubr.bf16.vlgmr.msra.gmra.mrb[0].mxu0 %v1691_v16 }
  0xa2   : > { %662 = vmatprep.mubr.bf16.mxu0 %v1945_v0 }
  0xa3   : > { %1561 = vmatmul.mubr.bf16.vlgmr.msra.gmra.mrb[0].mxu1 %v1694_v26 }
  0xa4   : > { %1564 = vmatprep.mubr.bf16.mxu1 %v1696_v27 }
  0xa9   : > { %663 = vmatmul.mubr.bf16.gmra.mrb[4].mxu0 %v1694_v26 }
  0xaa   : > { %672 = vmatprep.mubr.bf16.mxu0 %v1945_v0 }
  0xab   : > { %1565 = vmatmul.mubr.bf16.gmra.mrb[4].mxu1 %v1697_v28 }
  0xb1   : > { %673 = vmatmul.mubr.bf16.gmra.mrb[8].mxu0 %v1696_v27 }
  0xb2   : > { %682 = vmatprep.mubr.bf16.mxu0 %v1945_v0  ;;  %v2255_v0 = vrot.slane %v789_v61, %v792_v52 }
  0xb9   : > { %683 = vmatmul.mubr.bf16.gmra.mrb[12].mxu0 %v1697_v28 }
 0x174   : > { %v654_v29 = vpop.f32.mrb[0].mxu0 }
 0x175   : > { %758 = vst [vmem:[#allocation2] sm:$0xff] %v654_v29  ;;  %v656_v30 = vpop.f32.mrb[1].mxu0 }
 0x176   : > { %759 = vst [vmem:[#allocation2 + $0x8] sm:$0xff] %v656_v30  ;;  %v658_v31 = vpop.f32.mrb[2].mxu0  ;;  %v1562_v33 = vpop.f32.mrb[0].mxu1 }
 0x177   : > { %761 = vst [vmem:[#allocation2 + $0x18] sm:$0xff] %v658_v31  ;;  %v660_v32 = vpop.f32.mrb[3].mxu0  ;;  %766 = vst [vmem:[#allocation2 + $0x40] sm:$0xff] %v1562_v33  ;;  %v727_v34 = vpop.f32.mrb[1].mxu1 }
 0x178   : > { %762 = vst [vmem:[#allocation2 + $0x20] sm:$0xff] %v660_v32  ;;  %760 = vst [vmem:[#allocation2 + $0x10] sm:$0xff] %v727_v34  ;;  %v1563_v36 = vpop.f32.mrb[2].mxu1 }
 0x179   : > { %769 = vst [vmem:[#allocation2 + $0x58] sm:$0xff] %v1563_v36  ;;  %v730_v38 = vpop.f32.mrb[3].mxu1 }
 0x17a   : > { %763 = vst [vmem:[#allocation2 + $0x28] sm:$0xff] %v730_v38 }
 0x17c   : > { %v664_v35 = vpop.f32.mrb[4].mxu0 }
 0x17d   : > { %764 = vst [vmem:[#allocation2 + $0x30] sm:$0xff] %v664_v35  ;;  %v666_v37 = vpop.f32.mrb[5].mxu0 }
 0x17e   : > { %765 = vst [vmem:[#allocation2 + $0x38] sm:$0xff] %v666_v37  ;;  %v668_v39 = vpop.f32.mrb[6].mxu0  ;;  %v1566_v41 = vpop.f32.mrb[4].mxu1 }
 0x17f   : > { %767 = vst [vmem:[#allocation2 + $0x48] sm:$0xff] %v668_v39  ;;  %v670_v40 = vpop.f32.mrb[7].mxu0  ;;  %778 = vst [vmem:[#allocation2 + $0xa0] sm:$0xff] %v1566_v41  ;;  %v743_v42 = vpop.f32.mrb[5].mxu1 }
 0x180   : > { %768 = vst [vmem:[#allocation2 + $0x50] sm:$0xff] %v670_v40  ;;  %772 = vst [vmem:[#allocation2 + $0x70] sm:$0xff] %v743_v42  ;;  %v1567_v44 = vpop.f32.mrb[6].mxu1 }
 0x181   : > { %781 = vst [vmem:[#allocation2 + $0xb8] sm:$0xff] %v1567_v44  ;;  %v746_v47 = vpop.f32.mrb[7].mxu1 }
 0x182   : > { %775 = vst [vmem:[#allocation2 + $0x88] sm:$0xff] %v746_v47 }
 0x184   : > { %v674_v43 = vpop.f32.mrb[8].mxu0 }
 0x185   : > { %770 = vst [vmem:[#allocation2 + $0x60] sm:$0xff] %v674_v43  ;;  %v676_v46 = vpop.f32.mrb[9].mxu0  ;;  %v855_v43 = vld [vmem:[%s854_s30] sm:$0xf] }
 0x186   : > { %771 = vst [vmem:[#allocation2 + $0x68] sm:$0xff] %v676_v46  ;;  %v678_v48 = vpop.f32.mrb[10].mxu0  ;;  %v856_v47 = vunpack.c.l.bf16 %v855_v43 }
 0x187   : > { %773 = vst [vmem:[#allocation2 + $0x78] sm:$0xff] %v678_v48  ;;  %v680_v49 = vpop.f32.mrb[11].mxu0 }
 0x188   : > { %774 = vst [vmem:[#allocation2 + $0x80] sm:$0xff] %v680_v49 }
 0x18c   : > { %v684_v51 = vpop.f32.mrb[12].mxu0 }
 0x18d   : > { %776 = vst [vmem:[#allocation2 + $0x90] sm:$0xff] %v684_v51  ;;  %v686_v54 = vpop.f32.mrb[13].mxu0 }
 0x18e   : > { %777 = vst [vmem:[#allocation2 + $0x98] sm:$0xff] %v686_v54  ;;  %v688_v56 = vpop.f32.mrb[14].mxu0 }
 0x18f   : > { %779 = vst [vmem:[#allocation2 + $0xa8] sm:$0xff] %v688_v56  ;;  %v690_v57 = vpop.f32.mrb[15].mxu0 }
 0x190   : > { %780 = vst [vmem:[#allocation2 + $0xb0] sm:$0xff] %v690_v57 }
 0x197   : > { %v812_v2 = vld [vmem:[%s810_s20 + $0x8] sm:$0xff]  ;;  %v813_v3 = vld [vmem:[%s810_s20 + $0x10] sm:$0xff]  ;;  %v811_v18 = vld [vmem:[%s810_s20] sm:$0xff]  ;;  %s2282_s20 = sadd.s32 %s1495_s28, %s2216_s9 }
 0x198   : > { %v819_v4 = vadd.f32 %v818_v62, %v812_v2  ;;  %v830_v5 = vadd.f32 %v829_v63, %v813_v3  ;;  %v851_v28 = vld [vmem:[%s849_s13 + $0x8] sm:$0xff]  ;;  %v852_v29 = vld [vmem:[%s849_s13 + $0x10] sm:$0xff]  ;;  %s1526_s18 = smul.u32 24, %s2282_s20  ;;  %v850_v46 = vld [vmem:[%s849_s13] sm:$0xff]  ;;  %s1497_s13 = sshll.u32 %s2282_s20, 2 }
 0x199   : > { %s892_s1 = scalar_lea.vmem [#allocation4], %s1497_s13 }
 0x19a   : > { %v820_v6 = vadd.f32 %v819_v4, %v2255_v0  ;;  %v831_v7 = vadd.f32 %v830_v5, %v2257_v1  ;;  %s887_s26 = scalar_lea.vmem [#allocation2], %s1526_s18  ;;  %s1528_s18 = smul.u32 24, %s2220_s19 }
 0x19b   : > { %v889_v56 = vld [vmem:[%s887_s26 + $0x8] sm:$0xff]  ;;  %v890_v57 = vld [vmem:[%s887_s26 + $0x10] sm:$0xff] }
 0x19c   : > { %v821_v8 = vmul.f32 0.5, %v820_v6  ;;  %v832_v9 = vmul.f32 0.5, %v831_v7 }
 0x19e   : > { %1698 = vtanh.f32 %v821_v8 }
 0x19f   : > { %1700 = vtanh.f32 %v832_v9 }
 0x1a8   : > { %v1699_v10 = vpop.eup %1698 }
 0x1a9   : > { %v1701_v11 = vpop.eup %1700  ;;  %v823_v12 = vmul.f32 0.5, %v1699_v10 }
 0x1aa   : > { %v834_v13 = vmul.f32 0.5, %v1701_v11  ;;  %v893_v11 = vld [vmem:[%s892_s1] sm:$0xf] }
 0x1ab   : > { %v824_v14 = vadd.f32 0.5, %v823_v12  ;;  %v894_v15 = vunpack.c.l.bf16 %v893_v11 }
 0x1ac   : > { %v835_v16 = vadd.f32 0.5, %v834_v13 }
 0x1ad   : > { %v826_v17 = vsub.f32 1.0, %v824_v14  ;;  %v825_v20 = vmul.f32 %v824_v14, %v785_v60  ;;  %v888_v14 = vld [vmem:[%s887_s26] sm:$0xff]  ;;  %s409_s26 = scalar_lea.vmem [#allocation11], %s1454_s11  ;;  %s2330_s11 = scalar_lea.vmem [#allocation2], %s1528_s18 }
 0x1ae   : > { %v837_v22 = vsub.f32 1.0, %v835_v16 }
 0x1af   : > { %v827_v21 = vmul.f32 %v826_v17, %v811_v18 }
 0x1b0   : > { %v838_v25 = vmul.f32 %v837_v22, %v817_v19 }
 0x1b1   : > { %v828_v23 = vadd.f32 %v827_v21, %v825_v20 }
 0x1b3   : > { %v836_v24 = vmul.f32 %v835_v16, %v828_v23  ;;  %v857_v26 = vmul.f32 %v828_v23, %v2246_v58  ;;  %v868_v27 = vmul.f32 %v828_v23, %v2248_v59 }
 0x1b5   : > { %v839_v30 = vadd.f32 %v838_v25, %v836_v24  ;;  %v858_v31 = vadd.f32 %v857_v26, %v851_v28  ;;  %v869_v32 = vadd.f32 %v868_v27, %v852_v29 }
 0x1b7   : > { %v840_v33 = vpack.c.bf16 %v839_v30, %v839_v30  ;;  %v859_v34 = vadd.f32 %v858_v31, %v2255_v0  ;;  %v870_v35 = vadd.f32 %v869_v32, %v2257_v1 }
 0x1b9   : > { %843 = vst [vmem:[%s842_s7] sm:$0xf] %v840_v33  ;;  %v860_v36 = vmul.f32 0.5, %v859_v34  ;;  %v871_v37 = vmul.f32 0.5, %v870_v35  ;;  %s921_s7 = smul.u32 3, %s2213_s27 }
 0x1bb   : > { %1702 = vtanh.f32 %v860_v36  ;;  %s2297_s8 = sadd.s32 %s921_s7, %s2216_s9  ;;  %s919_s9 = scalar_lea.vmem %s2272_s23, %s1497_s13 [#allocation10] }
 0x1bc   : > { %1704 = vtanh.f32 %v871_v37  ;;  %s1527_s28 = smul.u32 24, %s2297_s8  ;;  %s2462_s30 = sshll.u32 %s2297_s8, 2 }
 0x1bd   : > { %s930_s20 = scalar_lea.vmem [#allocation4], %s2462_s30  ;;  %s1152_s13 = sshll.u32 %s409_s26, 4  ;;  %s2328_s13 = int_to_ptr.vmem [resolvable:$true] %s1152_s13 }
 0x1be   : > { %s925_s27 = scalar_lea.vmem [#allocation2], %s1527_s28 }
 0x1bf   : > { %v927_v24 = vld [vmem:[%s925_s27 + $0x8] sm:$0xff]  ;;  %v928_v25 = vld [vmem:[%s925_s27 + $0x10] sm:$0xff] }
 0x1c5   : > { %v1703_v38 = vpop.eup %1702 }
 0x1c6   : > { %v1705_v39 = vpop.eup %1704  ;;  %v862_v40 = vmul.f32 0.5, %v1703_v38  ;;  %v931_v38 = vld [vmem:[%s930_s20] sm:$0xf]  ;;  %s1947_s20 = smov [#allocation11]  }
 0x1c7   : > { %v873_v41 = vmul.f32 0.5, %v1705_v39  ;;  %v932_v43 = vunpack.c.l.bf16 %v931_v38 }
 0x1c8   : > { %v863_v42 = vadd.f32 0.5, %v862_v40 }
 0x1c9   : > { %v874_v44 = vadd.f32 0.5, %v873_v41 }
 0x1ca   : > { %v865_v45 = vsub.f32 1.0, %v863_v42  ;;  %v864_v48 = vmul.f32 %v863_v42, %v828_v23  ;;  %v926_v42 = vld [vmem:[%s925_s27] sm:$0xff]  ;;  %s1118_s27 = scalar_lea.sflag [#allocation12], %s2175_s15 }
 0x1cb   : > { %v876_v50 = vsub.f32 1.0, %v874_v44 }
 0x1cc   : > { %v866_v49 = vmul.f32 %v865_v45, %v850_v46 }
 0x1cd   : > { %v877_v53 = vmul.f32 %v876_v50, %v856_v47 }
 0x1ce   : > { %v867_v51 = vadd.f32 %v866_v49, %v864_v48  ;;  %v1946_v48 = vmov 0.0  }
 0x1cf   : > { %787 = vst [vmem:[%s409_s26] sm:$0xff] %v1946_v48  ;;  %s1822_s26 = sshll.u32 %s1947_s20, 4  ;;  %s1823_s26 = int_to_ptr.vmem [resolvable:$false] %s1822_s26 }
 0x1d0   : > { %v875_v52 = vmul.f32 %v874_v44, %v867_v51  ;;  %v895_v54 = vmul.f32 %v867_v51, %v2246_v58  ;;  %v906_v55 = vmul.f32 %v867_v51, %v2248_v59  ;;  %p1825_p8 = scmp.lt.s32.totalorder %s2328_s13, %s1823_s26 }
 0x1d2   : > { %v878_v60 = vadd.f32 %v877_v53, %v875_v52  ;;  %v896_v61 = vadd.f32 %v895_v54, %v889_v56  ;;  %v907_v62 = vadd.f32 %v906_v55, %v890_v57  ;;  %v965_v53 = vld [vmem:[%s2330_s11 + $0x8] sm:$0xff]  ;;  %v966_v54 = vld [vmem:[%s2330_s11 + $0x10] sm:$0xff] }
 0x1d4   : > { %v879_v63 = vpack.c.bf16 %v878_v60, %v878_v60  ;;  %v897_v2 = vadd.f32 %v896_v61, %v2255_v0  ;;  %v908_v3 = vadd.f32 %v907_v62, %v2257_v1 }
 0x1d6   : > { %882 = vst [vmem:[%s881_s17] sm:$0xf] %v879_v63  ;;  %v898_v4 = vmul.f32 0.5, %v897_v2  ;;  %v909_v5 = vmul.f32 0.5, %v908_v3  ;;  %s1519_s17 = sshll.u32 %s1928_s24, 7 }
 0x1d7   : > { %s2326_s28 = scalar_lea.hbm %s2448_s6, %s1519_s17  ;;  %s1824_s17 = scalar_lea.vmem %s1823_s26, 256 }
 0x1d8   : > { %1706 = vtanh.f32 %v898_v4 }
 0x1d9   : > { %1708 = vtanh.f32 %v909_v5 }
 0x1e2   : > { %v1707_v6 = vpop.eup %1706 }
 0x1e3   : > { %v1709_v7 = vpop.eup %1708  ;;  %v900_v8 = vmul.f32 0.5, %v1707_v6 }
 0x1e4   : > { %v911_v9 = vmul.f32 0.5, %v1709_v7 }
 0x1e5   : > { %v901_v10 = vadd.f32 0.5, %v900_v8 }
 0x1e6   : > { %v912_v12 = vadd.f32 0.5, %v911_v9 }
 0x1e7   : > { %v903_v13 = vsub.f32 1.0, %v901_v10  ;;  %v902_v16 = vmul.f32 %v901_v10, %v867_v51 }
 0x1e8   : > { %v914_v18 = vsub.f32 1.0, %v912_v12 }
 0x1e9   : > { %v904_v17 = vmul.f32 %v903_v13, %v888_v14 }
 0x1ea   : > { %v915_v21 = vmul.f32 %v914_v18, %v894_v15 }
 0x1eb   : > { %v905_v19 = vadd.f32 %v904_v17, %v902_v16 }
 0x1ed   : > { %v913_v20 = vmul.f32 %v912_v12, %v905_v19  ;;  %v933_v22 = vmul.f32 %v905_v19, %v2246_v58  ;;  %v944_v23 = vmul.f32 %v905_v19, %v2248_v59 }
 0x1ef   : > { %v916_v26 = vadd.f32 %v915_v21, %v913_v20  ;;  %v934_v27 = vadd.f32 %v933_v22, %v927_v24  ;;  %v945_v28 = vadd.f32 %v944_v23, %v928_v25 }
 0x1f1   : > { %v917_v29 = vpack.c.bf16 %v916_v26, %v916_v26  ;;  %v935_v30 = vadd.f32 %v934_v27, %v2255_v0  ;;  %v946_v31 = vadd.f32 %v945_v28, %v2257_v1 }
 0x1f3   : > { %920 = vst [vmem:[%s919_s9] sm:$0xf] %v917_v29  ;;  %v936_v32 = vmul.f32 0.5, %v935_v30  ;;  %v947_v33 = vmul.f32 0.5, %v946_v31  ;;  %s1818_s9 = scalar_lea.vmem %s2328_s13, 128 }
 0x1f4   : > { %p1819_p2 = scmp.ne.s32.totalorder %s2328_s13, %s1818_s9  ;;  %p1826_p4 = scmp.lt.s32.totalorder %s1824_s17, %s1818_s9 }
 0x1f5   : > { %1710 = vtanh.f32 %v936_v32 }
 0x1f6   : > { %1712 = vtanh.f32 %v947_v33  ;;  %p1820_p9 = pnand %p1819_p2, %p2487_p13  ;;  %p1827_p1 = por %p1826_p4, %p1825_p8 }
 0x1f8   : > { %p1821_p11 = pneg %p1820_p9 }
 0x1fa   : > { %p1828_p6 = pnand %p1827_p1, %p1821_p11 }
 0x1ff   : > { %v1711_v34 = vpop.eup %1710 }
 0x200   : > { %v1713_v35 = vpop.eup %1712  ;;  %v938_v36 = vmul.f32 0.5, %v1711_v34 }
 0x201   : > { %v949_v37 = vmul.f32 0.5, %v1713_v35 }
 0x202   : > { %v939_v39 = vadd.f32 0.5, %v938_v36 }
 0x203   : > { %v950_v40 = vadd.f32 0.5, %v949_v37 }
 0x204   : > { %v941_v41 = vsub.f32 1.0, %v939_v39  ;;  %v940_v44 = vmul.f32 %v939_v39, %v905_v19 }
 0x205   : > { %v952_v46 = vsub.f32 1.0, %v950_v40 }
 0x206   : > { %v942_v45 = vmul.f32 %v941_v41, %v926_v42 }
 0x207   : > { %v953_v50 = vmul.f32 %v952_v46, %v932_v43 }
 0x208   : > { %v2313_v47 = vadd.f32 %v942_v45, %v940_v44 }
 0x20a   : > { %v951_v49 = vmul.f32 %v950_v40, %v2313_v47  ;;  %v971_v51 = vmul.f32 %v2313_v47, %v2246_v58  ;;  %v982_v52 = vmul.f32 %v2313_v47, %v2248_v59 }
 0x20b   : > { %1831 = shalt.err (!%p1828_p6)
}
 0x20c   : > { %s1832_s18 = scalar_lea.hbm %s2326_s28, 128  ;;  %s1836_s20 = scalar_lea.hbm %s2448_s6, 256 }
 0x20d   : > { %p1833_p7 = scmp.ne.s32.totalorder %s2326_s28, %s1832_s18  ;;  %p1837_p10 = scmp.lt.u32.totalorder %s2326_s28, %s2448_s6 }
 0x20e   : > { %p1838_p0 = scmp.lt.u32.totalorder %s1836_s20, %s1832_s18  ;;  %p1840_p2 = scmp.lt.u32.totalorder %s1832_s18, %s2326_s28 }
 0x20f   : > { %p1834_p3 = pnand %p1833_p7, %p2487_p13 }
 0x210   : > { %p1839_p5 = por %p1838_p0, %p1837_p10 }
 0x211   : > { %p1835_p12 = pneg %p1834_p3 }
 0x212   : > { %p1841_p9 = por %p1840_p2, %p1839_p5 }
 0x214   : > { %p1842_p11 = pnand %p1841_p9, %p1835_p12 }
 0x216   : > { %1845 = shalt.err (!%p1842_p11)
}
 0x217   : > { %1580 = dma.vmem_to_hbm [thread:$0]  (%p2487_p13), %s2328_s13, 128, %s2326_s28, %s1118_s27   ;;  %v954_v55 = vadd.f32 %v953_v50, %v951_v49  ;;  %v972_v56 = vadd.f32 %v971_v51, %v965_v53  ;;  %v983_v57 = vadd.f32 %v982_v52, %v966_v54  ;;  %v964_v11 = vld [vmem:[%s2330_s11] sm:$0xff] }
 0x218   : > { %s2488_s9 = sshll.u32 %s2297_s8, 2  ;;  %s1504_s17 = sshll.u32 %s2220_s19, 2 }
 0x219   : > { %s957_s30 = scalar_lea.vmem %s2272_s23, %s2488_s9 [#allocation10]  ;;  %v955_v60 = vpack.c.bf16 %v954_v55, %v954_v55  ;;  %v973_v61 = vadd.f32 %v972_v56, %v2255_v0  ;;  %v984_v62 = vadd.f32 %v983_v57, %v2257_v1  ;;  %s968_s8 = scalar_lea.vmem [#allocation4], %s1504_s17 }
 0x21a   : > { %v969_v8 = vld [vmem:[%s968_s8] sm:$0xf]  ;;  %s1529_s13 = smul.u32 24, %s2225_s16  ;;  %s995_s28 = scalar_lea.vmem %s2272_s23, %s1504_s17 [#allocation10] }
 0x21b   : > { %v974_v63 = vmul.f32 0.5, %v973_v61  ;;  %v985_v2 = vmul.f32 0.5, %v984_v62  ;;  %958 = vst [vmem:[%s957_s30] sm:$0xf] %v955_v60  ;;  %v970_v12 = vunpack.c.l.bf16 %v969_v8  ;;  %s1507_s11 = sshll.u32 %s2225_s16, 2  ;;  %s1530_s18 = smul.u32 24, %s2229_s29 }
 0x21c   : > { %s1001_s19 = scalar_lea.vmem [#allocation2], %s1529_s13  ;;  %s1006_s27 = scalar_lea.vmem [#allocation4], %s1507_s11 }
 0x21d   : > { %1714 = vtanh.f32 %v974_v63  ;;  %v1003_v21 = vld [vmem:[%s1001_s19 + $0x8] sm:$0xff]  ;;  %v1004_v22 = vld [vmem:[%s1001_s19 + $0x10] sm:$0xff]  ;;  %v1007_v33 = vld [vmem:[%s1006_s27] sm:$0xf]  ;;  %s1039_s16 = scalar_lea.vmem [#allocation2], %s1530_s18  ;;  %s1033_s7 = scalar_lea.vmem %s2272_s23, %s1507_s11 [#allocation10] }
 0x21e   : > { %1716 = vtanh.f32 %v985_v2  ;;  %v1008_v37 = vunpack.c.l.bf16 %v1007_v33  ;;  %v1002_v41 = vld [vmem:[%s1001_s19] sm:$0xff]  ;;  %v1041_v49 = vld [vmem:[%s1039_s16 + $0x8] sm:$0xff]  ;;  %v1042_v50 = vld [vmem:[%s1039_s16 + $0x10] sm:$0xff]  ;;  %s1510_s1 = sshll.u32 %s2229_s29, 2  ;;  %s1531_s26 = smul.u32 24, %s2232_s14 }
 0x21f   : > { %s1044_s20 = scalar_lea.vmem [#allocation4], %s1510_s1  ;;  %s1071_s9 = scalar_lea.vmem %s2272_s23, %s1510_s1 [#allocation10] }
 0x220   : > { %v1045_v63 = vld [vmem:[%s1044_s20] sm:$0xf]  ;;  %s1077_s29 = scalar_lea.vmem [#allocation2], %s1531_s26  ;;  %s1513_s30 = sshll.u32 %s2232_s14, 2 }
 0x221   : > { %s1082_s17 = scalar_lea.vmem [#allocation4], %s1513_s30  ;;  %v1078_v33 = vld [vmem:[%s1077_s29] sm:$0xff]  ;;  %s1518_s14 = sshll.u32 %s1928_s24, 6 }
 0x222   : > { %s1136_s8 = sshll.u32 %s2272_s23, 4  ;;  %s1109_s13 = scalar_lea.vmem %s2272_s23, %s1513_s30 [#allocation10]  ;;  %s2393_s8 = int_to_ptr.vmem [resolvable:$true] %s1136_s8 }
 0x223   : > { %s2391_s11 = scalar_lea.hbm %s2447_s5, %s1518_s14  ;;  %s1113_s27 = scalar_lea.sflag [#allocation6], %s2175_s15 }
 0x224   : > { %s1846_s18 = scalar_lea.vmem %s2393_s8, 512  ;;  %s1948_s24 = smov [#allocation10]  }
 0x225   : > { %p1847_p8 = scmp.ne.s32.totalorder %s2393_s8, %s1846_s18  ;;  %s1850_s23 = sshll.u32 %s1948_s24, 4  ;;  %s1851_s23 = int_to_ptr.vmem [resolvable:$false] %s1850_s23 }
 0x226   : > { %p1853_p6 = scmp.lt.s32.totalorder %s2393_s8, %s1851_s23 }
 0x227   : > { %v1715_v3 = vpop.eup %1714  ;;  %p1848_p4 = pnand %p1847_p8, %p2487_p13 }
 0x228   : > { %v1717_v4 = vpop.eup %1716  ;;  %v976_v5 = vmul.f32 0.5, %v1715_v3 }
 0x229   : > { %v987_v6 = vmul.f32 0.5, %v1717_v4  ;;  %p1849_p1 = pneg %p1848_p4 }
 0x22a   : > { %v977_v7 = vadd.f32 0.5, %v976_v5  ;;  %v1046_v5 = vunpack.c.l.bf16 %v1045_v63 }
 0x22b   : > { %v988_v9 = vadd.f32 0.5, %v987_v6 }
 0x22c   : > { %v979_v10 = vsub.f32 1.0, %v977_v7  ;;  %v978_v13 = vmul.f32 %v977_v7, %v2313_v47 }
 0x22d   : > { %v990_v15 = vsub.f32 1.0, %v988_v9 }
 0x22e   : > { %v980_v14 = vmul.f32 %v979_v10, %v964_v11 }
 0x22f   : > { %v991_v18 = vmul.f32 %v990_v15, %v970_v12 }
 0x230   : > { %v981_v16 = vadd.f32 %v980_v14, %v978_v13 }
 0x232   : > { %v989_v17 = vmul.f32 %v988_v9, %v981_v16  ;;  %v1009_v19 = vmul.f32 %v981_v16, %v2246_v58  ;;  %v1020_v20 = vmul.f32 %v981_v16, %v2248_v59  ;;  %v1040_v9 = vld [vmem:[%s1039_s16] sm:$0xff]  ;;  %s1852_s16 = scalar_lea.vmem %s1851_s23, 1024 }
 0x233   : > { %p1854_p7 = scmp.lt.s32.totalorder %s1852_s16, %s1846_s18 }
 0x234   : > { %v992_v23 = vadd.f32 %v991_v18, %v989_v17  ;;  %v1010_v24 = vadd.f32 %v1009_v19, %v1003_v21  ;;  %v1021_v25 = vadd.f32 %v1020_v20, %v1004_v22  ;;  %v1079_v17 = vld [vmem:[%s1077_s29 + $0x8] sm:$0xff]  ;;  %v1080_v18 = vld [vmem:[%s1077_s29 + $0x10] sm:$0xff] }
 0x235   : > { %p1855_p3 = por %p1854_p7, %p1853_p6 }
 0x236   : > { %v993_v26 = vpack.c.bf16 %v992_v23, %v992_v23  ;;  %v1011_v27 = vadd.f32 %v1010_v24, %v2255_v0  ;;  %v1022_v28 = vadd.f32 %v1021_v25, %v2257_v1 }
 0x237   : > { %p1856_p12 = pnand %p1855_p3, %p1849_p1 }
 0x238   : > { %v1012_v29 = vmul.f32 0.5, %v1011_v27  ;;  %v1023_v30 = vmul.f32 0.5, %v1022_v28  ;;  %996 = vst [vmem:[%s995_s28] sm:$0xf] %v993_v26  ;;  %v1083_v27 = vld [vmem:[%s1082_s17] sm:$0xf] }
 0x23a   : > { %1718 = vtanh.f32 %v1012_v29 }
 0x23b   : > { %1720 = vtanh.f32 %v1023_v30 }
 0x244   : > { %v1719_v31 = vpop.eup %1718 }
 0x245   : > { %v1721_v32 = vpop.eup %1720  ;;  %v1014_v34 = vmul.f32 0.5, %v1719_v31  ;;  %v1084_v31 = vunpack.c.l.bf16 %v1083_v27 }
 0x246   : > { %v1025_v35 = vmul.f32 0.5, %v1721_v32 }
 0x247   : > { %v1015_v36 = vadd.f32 0.5, %v1014_v34 }
 0x248   : > { %v1026_v38 = vadd.f32 0.5, %v1025_v35 }
 0x249   : > { %v1016_v39 = vmul.f32 %v1015_v36, %v981_v16  ;;  %v1017_v40 = vsub.f32 1.0, %v1015_v36 }
 0x24a   : > { %v1028_v42 = vsub.f32 1.0, %v1026_v38 }
 0x24b   : > { %v1018_v43 = vmul.f32 %v1017_v40, %v1002_v41 }
 0x24c   : > { %v1029_v44 = vmul.f32 %v1028_v42, %v1008_v37 }
 0x24d   : > { %v1019_v45 = vadd.f32 %v1018_v43, %v1016_v39 }
 0x24f   : > { %v1027_v46 = vmul.f32 %v1026_v38, %v1019_v45  ;;  %v1047_v47 = vmul.f32 %v1019_v45, %v2246_v58  ;;  %v1058_v48 = vmul.f32 %v1019_v45, %v2248_v59 }
 0x251   : > { %v1030_v51 = vadd.f32 %v1029_v44, %v1027_v46  ;;  %v1048_v52 = vadd.f32 %v1047_v47, %v1041_v49  ;;  %v1059_v53 = vadd.f32 %v1058_v48, %v1042_v50 }
 0x253   : > { %v1031_v54 = vpack.c.bf16 %v1030_v51, %v1030_v51  ;;  %v1049_v55 = vadd.f32 %v1048_v52, %v2255_v0  ;;  %v1060_v56 = vadd.f32 %v1059_v53, %v2257_v1 }
 0x255   : > { %v1050_v57 = vmul.f32 0.5, %v1049_v55  ;;  %v1061_v60 = vmul.f32 0.5, %v1060_v56  ;;  %1034 = vst [vmem:[%s1033_s7] sm:$0xf] %v1031_v54 }
 0x257   : > { %1722 = vtanh.f32 %v1050_v57 }
 0x258   : > { %1724 = vtanh.f32 %v1061_v60 }
 0x261   : > { %v1723_v61 = vpop.eup %1722 }
 0x262   : > { %v1725_v62 = vpop.eup %1724  ;;  %v1052_v2 = vmul.f32 0.5, %v1723_v61 }
 0x263   : > { %v1063_v3 = vmul.f32 0.5, %v1725_v62 }
 0x264   : > { %v1053_v4 = vadd.f32 0.5, %v1052_v2 }
 0x265   : > { %v1064_v6 = vadd.f32 0.5, %v1063_v3 }
 0x266   : > { %v1054_v7 = vmul.f32 %v1053_v4, %v1019_v45  ;;  %v1055_v8 = vsub.f32 1.0, %v1053_v4 }
 0x267   : > { %v1066_v10 = vsub.f32 1.0, %v1064_v6 }
 0x268   : > { %v1056_v11 = vmul.f32 %v1055_v8, %v1040_v9 }
 0x269   : > { %v1067_v12 = vmul.f32 %v1066_v10, %v1046_v5 }
 0x26a   : > { %v1057_v13 = vadd.f32 %v1056_v11, %v1054_v7 }
 0x26c   : > { %v1065_v14 = vmul.f32 %v1064_v6, %v1057_v13  ;;  %v1085_v15 = vmul.f32 %v1057_v13, %v2246_v58  ;;  %v1096_v16 = vmul.f32 %v1057_v13, %v2248_v59 }
 0x26e   : > { %v1068_v19 = vadd.f32 %v1067_v12, %v1065_v14  ;;  %v1086_v20 = vadd.f32 %v1085_v15, %v1079_v17  ;;  %v1097_v21 = vadd.f32 %v1096_v16, %v1080_v18 }
 0x270   : > { %v1069_v22 = vpack.c.bf16 %v1068_v19, %v1068_v19  ;;  %v1087_v23 = vadd.f32 %v1086_v20, %v2255_v0  ;;  %v1098_v24 = vadd.f32 %v1097_v21, %v2257_v1 }
 0x272   : > { %v1088_v25 = vmul.f32 0.5, %v1087_v23  ;;  %v1099_v26 = vmul.f32 0.5, %v1098_v24  ;;  %1072 = vst [vmem:[%s1071_s9] sm:$0xf] %v1069_v22 }
 0x274   : > { %1726 = vtanh.f32 %v1088_v25 }
 0x275   : > { %1728 = vtanh.f32 %v1099_v26 }
 0x27e   : > { %v1727_v58 = vpop.eup %1726 }
 0x27f   : > { %v1729_v59 = vpop.eup %1728  ;;  %v1090_v28 = vmul.f32 0.5, %v1727_v58 }
 0x280   : > { %v1101_v29 = vmul.f32 0.5, %v1729_v59 }
 0x281   : > { %v1091_v30 = vadd.f32 0.5, %v1090_v28 }
 0x282   : > { %v1102_v0 = vadd.f32 0.5, %v1101_v29 }
 0x283   : > { %v1092_v32 = vmul.f32 %v1091_v30, %v1057_v13  ;;  %v1093_v1 = vsub.f32 1.0, %v1091_v30 }
 0x284   : > { %v1104_v34 = vsub.f32 1.0, %v1102_v0 }
 0x285   : > { %v1094_v35 = vmul.f32 %v1093_v1, %v1078_v33 }
 0x286   : > { %v1105_v36 = vmul.f32 %v1104_v34, %v1084_v31 }
 0x287   : > { %v1095_v37 = vadd.f32 %v1094_v35, %v1092_v32 }
 0x289   : > { %v1103_v38 = vmul.f32 %v1102_v0, %v1095_v37 }
 0x28b   : > { %v1106_v39 = vadd.f32 %v1105_v36, %v1103_v38 }
 0x28d   : > { %v1107_v40 = vpack.c.bf16 %v1106_v39, %v1106_v39 }
 0x28f   : > { %1110 = vst [vmem:[%s1109_s13] sm:$0xf] %v1107_v40 }
 0x290   : > { %1859 = shalt.err (!%p1856_p12)
}
 0x291   : > { %s1860_s7 = scalar_lea.hbm %s2391_s11, 512  ;;  %s1864_s26 = scalar_lea.hbm %s2447_s5, 1024 }
 0x292   : > { %p1861_p10 = scmp.ne.s32.totalorder %s2391_s11, %s1860_s7  ;;  %p1865_p2 = scmp.lt.u32.totalorder %s2391_s11, %s2447_s5 }
 0x293   : > { %p1866_p9 = scmp.lt.u32.totalorder %s1864_s26, %s1860_s7  ;;  %p1868_p8 = scmp.lt.u32.totalorder %s1860_s7, %s2391_s11 }
 0x294   : > { %p1862_p0 = pnand %p1861_p10, %p2487_p13 }
 0x295   : > { %p1867_p11 = por %p1866_p9, %p1865_p2 }
 0x296   : > { %p1863_p5 = pneg %p1862_p0 }
 0x297   : > { %p1869_p4 = por %p1868_p8, %p1867_p11 }
 0x299   : > { %p1870_p1 = pnand %p1869_p4, %p1863_p5 }
 0x29b   : > { %1873 = shalt.err (!%p1870_p1)
}
 0x29c   : > { %s1949_s30 = smov 64   ;;  %s1950_s17 = smov 128  }
 0x29d   : > { %s1951_s14 = smov 4  }
 0x29e   : > { %1579 = dma.vmem_to_hbm [thread:$0]  (%p2487_p13), %s2393_s8, 512, %s2391_s11, %s1113_s27, %s1949_s30, %s1950_s17, %s1951_s14  }
 0x29f PF: > { %s2489_s13 = sld [smem:[#allocation18_spill]]  ;;  %s1164_s19 = sand.u32 1, %s1916_s21  }
 0x2a0   : > { %p2490_p6 = scmp.ne.s32.totalorder %s2471_s12, 0  ;;  %s1165_s28 = scalar_lea.sflag [#allocation6], %s1164_s19 }
 0x2a5   : > { %p2491_p7 = scmp.ge.s32.totalorder %s2489_s13, 2 }
 0x2a7   : > { %p1594_p3 = pnand %p2491_p7, %p2490_p6 }
 0x2a9   : > { %1907 = dma.done.wait (!%p1594_p3), %s1165_s28, 512  }
 0x2aa   : > { %1909 = vsyncadd (!%p1594_p3), %s1165_s28, 4294966784  ;;  %s1174_s18 = scalar_lea.sflag [#allocation12], %s1164_s19 }
 0x2ab   : > { %1911 = dma.done.wait (!%p1594_p3), %s1174_s18, 128  }
 0x2ac   : > { %1913 = vsyncadd (!%p1594_p3), %s1174_s18, 4294967168  ;;  %s29_s26 = sadd.s32 1, %s2489_s13   ;;  %s2492_s10 = sld [smem:[#allocation17_spill]] }
 0x2ad   : > { %p26_p12 = scmp.ge.s32.totalorder %s29_s26, 4   ;;  %s2493_s23 = sld [smem:[#allocation20_spill]] }
 0x2ae   : > { %s2494_s15 = sld [smem:[#allocation19_spill]]  ;;  %s2495_s21 = smov %s1920_s22 }
 0x2af   : > { %s2497_s24 = smov %s1932_s25  ;;  %28 = sbr.rel (!%p26_p12) target bundleno = 12 (0xc), region = 160 }
 0x2b2   : > { %s2496_s22 = smov %s2492_s10 }
 0x2b4   : > { %s2498_s25 = smov %s2494_s15 }
 0x2b6   :  { %1179 = vsyncpa [#allocation5], 1 }
 0x2b7   :  { %1181 = vsyncpa [#allocation5 + $0x1], 1 }
 0x2b8   :  { %1182 = vsyncpa [#allocation8], 1 }
 0x2b9   :  { %1184 = vsyncpa [#allocation8 + $0x1], 1 }
 0x2ba   :  { %1185 = vsyncpa [#allocation6], 1 }
 0x2bb   :  { %1187 = vsyncpa [#allocation6 + $0x1], 1 }
 0x2bc   :  { %1188 = vsyncpa [#allocation12], 1 }
 0x2bd   :  { %1190 = vsyncpa [#allocation12 + $0x1], 1 }

</bundles_post_ra>
